<compile_context>
chip_gen: v7x
topology: tpu7x:2x2x1
jax: 0.10.0
libtpu: 0.0.40
codegen_flags: <defaults>
</compile_context>

<pallas_src>
import functools

import jax
import jax.numpy as jnp
from jax.experimental import pallas as pl
from jax.experimental.pallas import tpu as pltpu


# ----------------------------------------------------------------------------
# In-kernel helper: attention + aggregation for all heads of one layer
# ----------------------------------------------------------------------------
def _gat_heads(adj, hb, n_heads, f_out, alpha, apply_elu):
    """adj: [N, N] f32 0/1 mask (row = aggregation target, col = neighbour).
    hb : [N, n_heads*f_out + 2*n_heads] fused projection output:
         cols [h*f_out:(h+1)*f_out]         -> features of head h
         col  [n_heads*f_out + h]           -> a_src . h_feat   (head h)
         col  [n_heads*f_out + n_heads + h] -> a_dst . h_feat   (head h)
    Returns list of [N, f_out] per-head aggregated features."""
    nf = n_heads * f_out
    neg_big = jnp.float32(-1e30)
    eps = jnp.float32(9e-15)
    outs = []
    for h in range(n_heads):
        hf = hb[:, h * f_out:(h + 1) * f_out]                    # [N, Fout]
        att_s = hb[:, nf + h:nf + h + 1]                         # [N, 1]
        att_d = hb[:, nf + n_heads + h:nf + n_heads + h + 1]     # [N, 1]
        e = att_s + jnp.transpose(att_d)                         # [N, N]
        e = jnp.where(e > 0, e, alpha * e)                       # LeakyReLU
        # Per-row max over edges (global max is equivalent after the rowsum
        # normalisation; per-row enables row tiling at large N).
        rowmax = jnp.max(jnp.where(adj > 0, e, neg_big), axis=1, keepdims=True)
        # min(.,0) keeps non-edge lanes finite before the *0 mask (exact on edges,
        # so empty rows stay 0 instead of NaN).
        edge_e = adj * jnp.exp(jnp.minimum(e - rowmax, 0.0))     # [N, N]
        rowsum = jnp.sum(edge_e, axis=1, keepdims=True)          # [N, 1]
        hp = jnp.dot(edge_e, hf, preferred_element_type=jnp.float32)
        hp = hp * pl.reciprocal(rowsum + eps, approx=True)       # EUP divide
        if apply_elu:
            hp = jnp.where(hp > 0, hp, jnp.exp(jnp.minimum(hp, 0.0)) - 1.0)
        outs.append(hp)
    return outs


# ----------------------------------------------------------------------------
# Fused kernel: both GAT layers + mean/ELU/log_softmax epilogue
# ----------------------------------------------------------------------------
def spagat_fused_kernel(x_ref, adj_ref, w1_ref, b1_ref, w2_ref, b2_ref, o_ref,
                        *, alpha, h1, f1, h2, f2):
    adj = adj_ref[...].astype(jnp.float32)      # bf16 0/1 mask -> f32

    # Layer 1: one MXU matmul covering all heads + folded attention vectors.
    hb1 = jnp.dot(x_ref[...], w1_ref[...],
                  preferred_element_type=jnp.float32) + b1_ref[...]
    heads1 = _gat_heads(adj, hb1, h1, f1, alpha, apply_elu=True)

    # Layer 2 projection: cat(heads1, dim=1) @ W2 without materialising the
    # concat -- per-head partial matmuls against row blocks of W2.
    w2 = w2_ref[...]
    hb2 = b2_ref[...]
    for h, hp in enumerate(heads1):
        hb2 = hb2 + jnp.dot(hp, w2[h * f1:(h + 1) * f1, :],
                            preferred_element_type=jnp.float32)
    heads2 = _gat_heads(adj, hb2, h2, f2, alpha, apply_elu=False)

    # mean over output heads -> ELU -> log_softmax(dim=1)
    m = heads2[0]
    for hp in heads2[1:]:
        m = m + hp
    m = m * jnp.float32(1.0 / h2)
    m = jnp.where(m > 0, m, jnp.exp(jnp.minimum(m, 0.0)) - 1.0)   # ELU
    mx = jnp.max(m, axis=1, keepdims=True)
    lse = jnp.log(jnp.sum(jnp.exp(m - mx), axis=1, keepdims=True))
    o_ref[...] = m - mx - lse


# ----------------------------------------------------------------------------
# Wrapper: weight folding + pallas_call
# ----------------------------------------------------------------------------
def _fold_layer_params(W, bias, a_src, a_dst):
    """Stack per-head weights lane-dense and fold attention vectors in:
       W_cat = [W_0 | .. | W_{H-1} | W a_src^T | W a_dst^T]  (+ matching bias)."""
    H, Fin, Fout = W.shape
    w_feat = jnp.transpose(W, (1, 0, 2)).reshape(Fin, H * Fout)
    b_feat = jnp.transpose(bias, (1, 0, 2)).reshape(1, H * Fout)
    w_src = jnp.einsum('hif,hf->ih', W, a_src[:, 0, :])          # [Fin, H]
    w_dst = jnp.einsum('hif,hf->ih', W, a_dst[:, 0, :])          # [Fin, H]
    b_src = jnp.einsum('hf,hf->h', bias[:, 0, :], a_src[:, 0, :])[None, :]
    b_dst = jnp.einsum('hf,hf->h', bias[:, 0, :], a_dst[:, 0, :])[None, :]
    w_cat = jnp.concatenate([w_feat, w_src, w_dst], axis=1).astype(jnp.float32)
    b_cat = jnp.concatenate([b_feat, b_src, b_dst], axis=1).astype(jnp.float32)
    return w_cat, b_cat


def spagat_forward(x, adj_mask, params1, params2, *, alpha):
    # TODO(synk): dropout layers are identity (eval mode); the SPAGAN path
    # attention (mode='SPAGAN') and genPath .npz dumping are not exercised by
    # the default forward (mode='GAT') and are not implemented.
    W1, b1, as1, ad1 = params1
    W2, b2, as2, ad2 = params2
    H1, Fin, F1 = W1.shape
    H2, Fmid, F2 = W2.shape
    assert Fmid == H1 * F1
    N = x.shape[0]

    w1c, b1c = _fold_layer_params(W1, b1, as1, ad1)
    w2c, b2c = _fold_layer_params(W2, b2, as2, ad2)
    adj_bf16 = adj_mask.astype(jnp.bfloat16)     # 0/1 exact; halves HBM bytes

    kernel = functools.partial(spagat_fused_kernel,
                               alpha=alpha, h1=H1, f1=F1, h2=H2, f2=F2)
    # TODO(synk): for large N, tile the adjacency flash-style over (row, col)
    # blocks with online row-max/rowsum scratch and mark the row axis
    # "parallel" (v7x: 2 TCs, 64 MiB VMEM).  At this problem size a single
    # fused invocation is launch-latency optimal.
    return pl.pallas_call(
        kernel,
        out_shape=jax.ShapeDtypeStruct((N, F2), jnp.float32),
        in_specs=[
            pl.BlockSpec((N, Fin), lambda: (0, 0)),      # x
            pl.BlockSpec((N, N), lambda: (0, 0)),        # adjacency mask (bf16)
            pl.BlockSpec(w1c.shape, lambda: (0, 0)),     # folded layer-1 weights
            pl.BlockSpec(b1c.shape, lambda: (0, 0)),
            pl.BlockSpec(w2c.shape, lambda: (0, 0)),     # folded layer-2 weights
            pl.BlockSpec(b2c.shape, lambda: (0, 0)),
        ],
        out_specs=pl.BlockSpec((N, F2), lambda: (0, 0)),
        compiler_params=pltpu.CompilerParams(vmem_limit_bytes=32 * 1024 * 1024),
    )(x, adj_bf16, w1c, b1c, w2c, b2c)


# ----------------------------------------------------------------------------
# Pure-JAX reference (mirrors the torch module, dense-masked, eval mode)
# ----------------------------------------------------------------------------
def spagat_reference(x, adj_mask, params1, params2, alpha):
    def head(feat, W, b, a_s, a_d, apply_elu):
        h = feat @ W + b
        att_s = h @ a_s.T
        att_d = h @ a_d.T
        e = att_s + att_d.T
        e = jnp.where(e > 0, e, alpha * e)
        mask = adj_mask > 0
        gmax = jnp.max(jnp.where(mask, e, -jnp.inf))          # global edge max
        edge_e = jnp.where(mask, jnp.exp(e - gmax), 0.0)
        rowsum = edge_e.sum(1, keepdims=True)
        hp = (edge_e @ h) / (rowsum + 9e-15)
        return jnp.where(hp > 0, hp, jnp.expm1(hp)) if apply_elu else hp

    W1, b1, as1, ad1 = params1
    W2, b2, as2, ad2 = params2
    x1 = jnp.concatenate([head(x, W1[h], b1[h], as1[h], ad1[h], True)
                          for h in range(W1.shape[0])], axis=1)
    outs = [head(x1, W2[h], b2[h], as2[h], ad2[h], False)
            for h in range(W2.shape[0])]
    m = jnp.mean(jnp.stack(outs, axis=0), axis=0)
    m = jnp.where(m > 0, m, jnp.expm1(m))
    return jax.nn.log_softmax(m, axis=1)


# ----------------------------------------------------------------------------
# Parameter construction (deterministic xavier_normal_-style init)
# ----------------------------------------------------------------------------
def xavier_normal(key, shape, gain=1.414):
    fan_in, fan_out = shape[-2], shape[-1]
    std = gain * (2.0 / (fan_in + fan_out)) ** 0.5
    return std * jax.random.normal(key, shape, dtype=jnp.float32)


def make_layer_params(key, n_heads, fin, fout):
    ks = jax.random.split(key, 3)
    W = xavier_normal(ks[0], (n_heads, fin, fout))
    bias = xavier_normal(ks[1], (n_heads, 1, fout))
    a = xavier_normal(ks[2], (n_heads, 1, 2 * fout))    # torch a is [1, 2*Fout]
    return W, bias, a[:, :, :fout], a[:, :, fout:]


if __name__ == "__main__":
    key = jax.random.PRNGKey(0)
    k_x, k_adj, k_p1, k_p2 = jax.random.split(key, 4)

    # Small shapes consistent with the module
    N = 64          # number of graph nodes
    nfeat = 16
    nhid = 8
    nclass = 4
    nheads = (2, 2)
    alpha = 0.2     # LeakyReLU negative slope

    x = jax.random.normal(k_x, (N, nfeat), dtype=jnp.float32)

    # dense 0/1 adjacency mask (symmetric + self loops), row = edge[0]
    a_rand = jax.random.bernoulli(k_adj, p=0.15, shape=(N, N)).astype(jnp.float32)
    adj = jnp.maximum(a_rand, a_rand.T)
    adj = jnp.maximum(adj, jnp.eye(N, dtype=jnp.float32))

    params1 = make_layer_params(k_p1, nheads[0], nfeat, nhid)
    params2 = make_layer_params(k_p2, nheads[1], nhid * nheads[0], nclass)

    fwd = jax.jit(functools.partial(spagat_forward, alpha=alpha))
    out = jax.block_until_ready(fwd(x, adj, params1, params2))

    assert out.shape == (N, nclass), out.shape
    assert bool(jnp.all(jnp.isfinite(out)))
    # rows of log_softmax should exponentiate-sum to ~1
    assert bool(jnp.allclose(jnp.sum(jnp.exp(out), axis=1), 1.0, atol=1e-4))

    # check against pure-JAX reference (loose tol: approx reciprocal on EUP)
    ref = spagat_reference(x, adj, params1, params2, alpha)
    assert bool(jnp.allclose(out, ref, atol=5e-2, rtol=5e-2)), (
        float(jnp.max(jnp.abs(out - ref))))

    print("KERNEL_OK")
</pallas_src>

<mosaic_0001>
module attributes {stable_mosaic.version = 11 : i64} {
  func.func @spagat_fused_kernel(%arg0: memref<64x16xf32, #tpu.memory_space<vmem>>, %arg1: memref<64x64xbf16, #tpu.memory_space<vmem>>, %arg2: memref<16x20xf32, #tpu.memory_space<vmem>>, %arg3: memref<1x20xf32, #tpu.memory_space<vmem>>, %arg4: memref<16x12xf32, #tpu.memory_space<vmem>>, %arg5: memref<1x12xf32, #tpu.memory_space<vmem>>, %arg6: memref<64x4xf32, #tpu.memory_space<vmem>>) attributes {dimension_semantics = [], scalar_prefetch = 0 : i64, scratch_operands = 0 : i64, tpu.core_type = #tpu.core_type<tc>} {
    %c0 = arith.constant 0 : index
    %c0_0 = arith.constant 0 : index
    %0 = vector.load %arg1[%c0, %c0_0] : memref<64x64xbf16, #tpu.memory_space<vmem>>, vector<64x64xbf16>
    %1 = arith.extf %0 : vector<64x64xbf16> to vector<64x64xf32>
    %c0_1 = arith.constant 0 : index
    %c0_2 = arith.constant 0 : index
    %2 = vector.load %arg0[%c0_1, %c0_2] : memref<64x16xf32, #tpu.memory_space<vmem>>, vector<64x16xf32>
    %c0_3 = arith.constant 0 : index
    %c0_4 = arith.constant 0 : index
    %3 = vector.load %arg2[%c0_3, %c0_4] : memref<16x20xf32, #tpu.memory_space<vmem>>, vector<16x20xf32>
    %cst = arith.constant dense<0.000000e+00> : vector<64x20xf32>
    %4 = tpu.matmul %2, %3, %cst {dimension_numbers = #tpu.dot_dimension_numbers<[1], [0], [0], [1], [0, 0, 1, 1], [], []>} : vector<64x16xf32>, vector<16x20xf32>, vector<64x20xf32> -> vector<64x20xf32>
    %c0_5 = arith.constant 0 : index
    %c0_6 = arith.constant 0 : index
    %5 = vector.load %arg3[%c0_5, %c0_6] : memref<1x20xf32, #tpu.memory_space<vmem>>, vector<1x20xf32>
    %6 = vector.broadcast %5 : vector<1x20xf32> to vector<64x20xf32>
    %7 = arith.addf %4, %6 : vector<64x20xf32>
    %8 = vector.extract_strided_slice %7 {offsets = [0, 0], sizes = [64, 8], strides = [1, 1]} : vector<64x20xf32> to vector<64x8xf32>
    %9 = vector.extract_strided_slice %7 {offsets = [0, 16], sizes = [64, 1], strides = [1, 1]} : vector<64x20xf32> to vector<64x1xf32>
    %10 = vector.extract_strided_slice %7 {offsets = [0, 18], sizes = [64, 1], strides = [1, 1]} : vector<64x20xf32> to vector<64x1xf32>
    %11 = tpu.transpose %10, [1, 0] : vector<64x1xf32> -> vector<1x64xf32>
    %12 = vector.broadcast %9 : vector<64x1xf32> to vector<64x64xf32>
    %13 = vector.broadcast %11 : vector<1x64xf32> to vector<64x64xf32>
    %14 = arith.addf %12, %13 : vector<64x64xf32>
    %cst_7 = arith.constant 0.000000e+00 : f32
    %15 = vector.broadcast %cst_7 : f32 to vector<64x64xf32>
    %16 = arith.cmpf ogt, %14, %15 : vector<64x64xf32>
    %cst_8 = arith.constant 2.000000e-01 : f32
    %17 = vector.broadcast %cst_8 : f32 to vector<64x64xf32>
    %18 = arith.mulf %17, %14 : vector<64x64xf32>
    %19 = arith.select %16, %14, %18 : vector<64x64xi1>, vector<64x64xf32>
    %cst_9 = arith.constant 0.000000e+00 : f32
    %20 = vector.broadcast %cst_9 : f32 to vector<64x64xf32>
    %21 = arith.cmpf ogt, %1, %20 : vector<64x64xf32>
    %cst_10 = arith.constant -1.000000e+30 : f32
    %22 = vector.broadcast %cst_10 : f32 to vector<64x64xf32>
    %23 = arith.select %21, %19, %22 : vector<64x64xi1>, vector<64x64xf32>
    %cst_11 = arith.constant dense<0xFF800000> : vector<64xf32>
    %24 = vector.multi_reduction <maximumf>, %23, %cst_11 [1] : vector<64x64xf32> to vector<64xf32>
    %25 = vector.shape_cast %24 : vector<64xf32> to vector<64x1xf32>
    %26 = vector.broadcast %25 : vector<64x1xf32> to vector<64x64xf32>
    %27 = arith.subf %19, %26 : vector<64x64xf32>
    %cst_12 = arith.constant 0.000000e+00 : f32
    %28 = vector.broadcast %cst_12 : f32 to vector<64x64xf32>
    %29 = arith.minimumf %27, %28 : vector<64x64xf32>
    %30 = math.exp %29 : vector<64x64xf32>
    %31 = arith.mulf %1, %30 : vector<64x64xf32>
    %cst_13 = arith.constant dense<0.000000e+00> : vector<64xf32>
    %32 = vector.multi_reduction <add>, %31, %cst_13 [1] : vector<64x64xf32> to vector<64xf32>
    %33 = vector.shape_cast %32 : vector<64xf32> to vector<64x1xf32>
    %cst_14 = arith.constant dense<0.000000e+00> : vector<64x8xf32>
    %34 = tpu.matmul %31, %8, %cst_14 {dimension_numbers = #tpu.dot_dimension_numbers<[1], [0], [0], [1], [0, 0, 1, 1], [], []>} : vector<64x64xf32>, vector<64x8xf32>, vector<64x8xf32> -> vector<64x8xf32>
    %cst_15 = arith.constant 9.000000e-15 : f32
    %35 = vector.broadcast %cst_15 : f32 to vector<64x1xf32>
    %36 = arith.addf %33, %35 : vector<64x1xf32>
    %37 = tpu.reciprocal %36 {approx = true} : vector<64x1xf32> -> vector<64x1xf32>
    %38 = vector.broadcast %37 : vector<64x1xf32> to vector<64x8xf32>
    %39 = arith.mulf %34, %38 : vector<64x8xf32>
    %cst_16 = arith.constant 0.000000e+00 : f32
    %40 = vector.broadcast %cst_16 : f32 to vector<64x8xf32>
    %41 = arith.cmpf ogt, %39, %40 : vector<64x8xf32>
    %cst_17 = arith.constant 0.000000e+00 : f32
    %42 = vector.broadcast %cst_17 : f32 to vector<64x8xf32>
    %43 = arith.minimumf %39, %42 : vector<64x8xf32>
    %44 = math.exp %43 : vector<64x8xf32>
    %cst_18 = arith.constant 1.000000e+00 : f32
    %45 = vector.broadcast %cst_18 : f32 to vector<64x8xf32>
    %46 = arith.subf %44, %45 : vector<64x8xf32>
    %47 = arith.select %41, %39, %46 : vector<64x8xi1>, vector<64x8xf32>
    %48 = vector.extract_strided_slice %7 {offsets = [0, 8], sizes = [64, 8], strides = [1, 1]} : vector<64x20xf32> to vector<64x8xf32>
    %49 = vector.extract_strided_slice %7 {offsets = [0, 17], sizes = [64, 1], strides = [1, 1]} : vector<64x20xf32> to vector<64x1xf32>
    %50 = vector.extract_strided_slice %7 {offsets = [0, 19], sizes = [64, 1], strides = [1, 1]} : vector<64x20xf32> to vector<64x1xf32>
    %51 = tpu.transpose %50, [1, 0] : vector<64x1xf32> -> vector<1x64xf32>
    %52 = vector.broadcast %49 : vector<64x1xf32> to vector<64x64xf32>
    %53 = vector.broadcast %51 : vector<1x64xf32> to vector<64x64xf32>
    %54 = arith.addf %52, %53 : vector<64x64xf32>
    %cst_19 = arith.constant 0.000000e+00 : f32
    %55 = vector.broadcast %cst_19 : f32 to vector<64x64xf32>
    %56 = arith.cmpf ogt, %54, %55 : vector<64x64xf32>
    %cst_20 = arith.constant 2.000000e-01 : f32
    %57 = vector.broadcast %cst_20 : f32 to vector<64x64xf32>
    %58 = arith.mulf %57, %54 : vector<64x64xf32>
    %59 = arith.select %56, %54, %58 : vector<64x64xi1>, vector<64x64xf32>
    %cst_21 = arith.constant 0.000000e+00 : f32
    %60 = vector.broadcast %cst_21 : f32 to vector<64x64xf32>
    %61 = arith.cmpf ogt, %1, %60 : vector<64x64xf32>
    %cst_22 = arith.constant -1.000000e+30 : f32
    %62 = vector.broadcast %cst_22 : f32 to vector<64x64xf32>
    %63 = arith.select %61, %59, %62 : vector<64x64xi1>, vector<64x64xf32>
    %cst_23 = arith.constant dense<0xFF800000> : vector<64xf32>
    %64 = vector.multi_reduction <maximumf>, %63, %cst_23 [1] : vector<64x64xf32> to vector<64xf32>
    %65 = vector.shape_cast %64 : vector<64xf32> to vector<64x1xf32>
    %66 = vector.broadcast %65 : vector<64x1xf32> to vector<64x64xf32>
    %67 = arith.subf %59, %66 : vector<64x64xf32>
    %cst_24 = arith.constant 0.000000e+00 : f32
    %68 = vector.broadcast %cst_24 : f32 to vector<64x64xf32>
    %69 = arith.minimumf %67, %68 : vector<64x64xf32>
    %70 = math.exp %69 : vector<64x64xf32>
    %71 = arith.mulf %1, %70 : vector<64x64xf32>
    %cst_25 = arith.constant dense<0.000000e+00> : vector<64xf32>
    %72 = vector.multi_reduction <add>, %71, %cst_25 [1] : vector<64x64xf32> to vector<64xf32>
    %73 = vector.shape_cast %72 : vector<64xf32> to vector<64x1xf32>
    %cst_26 = arith.constant dense<0.000000e+00> : vector<64x8xf32>
    %74 = tpu.matmul %71, %48, %cst_26 {dimension_numbers = #tpu.dot_dimension_numbers<[1], [0], [0], [1], [0, 0, 1, 1], [], []>} : vector<64x64xf32>, vector<64x8xf32>, vector<64x8xf32> -> vector<64x8xf32>
    %cst_27 = arith.constant 9.000000e-15 : f32
    %75 = vector.broadcast %cst_27 : f32 to vector<64x1xf32>
    %76 = arith.addf %73, %75 : vector<64x1xf32>
    %77 = tpu.reciprocal %76 {approx = true} : vector<64x1xf32> -> vector<64x1xf32>
    %78 = vector.broadcast %77 : vector<64x1xf32> to vector<64x8xf32>
    %79 = arith.mulf %74, %78 : vector<64x8xf32>
    %cst_28 = arith.constant 0.000000e+00 : f32
    %80 = vector.broadcast %cst_28 : f32 to vector<64x8xf32>
    %81 = arith.cmpf ogt, %79, %80 : vector<64x8xf32>
    %cst_29 = arith.constant 0.000000e+00 : f32
    %82 = vector.broadcast %cst_29 : f32 to vector<64x8xf32>
    %83 = arith.minimumf %79, %82 : vector<64x8xf32>
    %84 = math.exp %83 : vector<64x8xf32>
    %cst_30 = arith.constant 1.000000e+00 : f32
    %85 = vector.broadcast %cst_30 : f32 to vector<64x8xf32>
    %86 = arith.subf %84, %85 : vector<64x8xf32>
    %87 = arith.select %81, %79, %86 : vector<64x8xi1>, vector<64x8xf32>
    %c0_31 = arith.constant 0 : index
    %c0_32 = arith.constant 0 : index
    %88 = vector.load %arg4[%c0_31, %c0_32] : memref<16x12xf32, #tpu.memory_space<vmem>>, vector<16x12xf32>
    %c0_33 = arith.constant 0 : index
    %c0_34 = arith.constant 0 : index
    %89 = vector.load %arg5[%c0_33, %c0_34] : memref<1x12xf32, #tpu.memory_space<vmem>>, vector<1x12xf32>
    %90 = vector.extract_strided_slice %88 {offsets = [0, 0], sizes = [8, 12], strides = [1, 1]} : vector<16x12xf32> to vector<8x12xf32>
    %cst_35 = arith.constant dense<0.000000e+00> : vector<64x12xf32>
    %91 = tpu.matmul %47, %90, %cst_35 {dimension_numbers = #tpu.dot_dimension_numbers<[1], [0], [0], [1], [0, 0, 1, 1], [], []>} : vector<64x8xf32>, vector<8x12xf32>, vector<64x12xf32> -> vector<64x12xf32>
    %92 = vector.broadcast %89 : vector<1x12xf32> to vector<64x12xf32>
    %93 = arith.addf %92, %91 : vector<64x12xf32>
    %94 = vector.extract_strided_slice %88 {offsets = [8, 0], sizes = [8, 12], strides = [1, 1]} : vector<16x12xf32> to vector<8x12xf32>
    %cst_36 = arith.constant dense<0.000000e+00> : vector<64x12xf32>
    %95 = tpu.matmul %87, %94, %cst_36 {dimension_numbers = #tpu.dot_dimension_numbers<[1], [0], [0], [1], [0, 0, 1, 1], [], []>} : vector<64x8xf32>, vector<8x12xf32>, vector<64x12xf32> -> vector<64x12xf32>
    %96 = arith.addf %93, %95 : vector<64x12xf32>
    %97 = vector.extract_strided_slice %96 {offsets = [0, 0], sizes = [64, 4], strides = [1, 1]} : vector<64x12xf32> to vector<64x4xf32>
    %98 = vector.extract_strided_slice %96 {offsets = [0, 8], sizes = [64, 1], strides = [1, 1]} : vector<64x12xf32> to vector<64x1xf32>
    %99 = vector.extract_strided_slice %96 {offsets = [0, 10], sizes = [64, 1], strides = [1, 1]} : vector<64x12xf32> to vector<64x1xf32>
    %100 = tpu.transpose %99, [1, 0] : vector<64x1xf32> -> vector<1x64xf32>
    %101 = vector.broadcast %98 : vector<64x1xf32> to vector<64x64xf32>
    %102 = vector.broadcast %100 : vector<1x64xf32> to vector<64x64xf32>
    %103 = arith.addf %101, %102 : vector<64x64xf32>
    %cst_37 = arith.constant 0.000000e+00 : f32
    %104 = vector.broadcast %cst_37 : f32 to vector<64x64xf32>
    %105 = arith.cmpf ogt, %103, %104 : vector<64x64xf32>
    %cst_38 = arith.constant 2.000000e-01 : f32
    %106 = vector.broadcast %cst_38 : f32 to vector<64x64xf32>
    %107 = arith.mulf %106, %103 : vector<64x64xf32>
    %108 = arith.select %105, %103, %107 : vector<64x64xi1>, vector<64x64xf32>
    %cst_39 = arith.constant 0.000000e+00 : f32
    %109 = vector.broadcast %cst_39 : f32 to vector<64x64xf32>
    %110 = arith.cmpf ogt, %1, %109 : vector<64x64xf32>
    %cst_40 = arith.constant -1.000000e+30 : f32
    %111 = vector.broadcast %cst_40 : f32 to vector<64x64xf32>
    %112 = arith.select %110, %108, %111 : vector<64x64xi1>, vector<64x64xf32>
    %cst_41 = arith.constant dense<0xFF800000> : vector<64xf32>
    %113 = vector.multi_reduction <maximumf>, %112, %cst_41 [1] : vector<64x64xf32> to vector<64xf32>
    %114 = vector.shape_cast %113 : vector<64xf32> to vector<64x1xf32>
    %115 = vector.broadcast %114 : vector<64x1xf32> to vector<64x64xf32>
    %116 = arith.subf %108, %115 : vector<64x64xf32>
    %cst_42 = arith.constant 0.000000e+00 : f32
    %117 = vector.broadcast %cst_42 : f32 to vector<64x64xf32>
    %118 = arith.minimumf %116, %117 : vector<64x64xf32>
    %119 = math.exp %118 : vector<64x64xf32>
    %120 = arith.mulf %1, %119 : vector<64x64xf32>
    %cst_43 = arith.constant dense<0.000000e+00> : vector<64xf32>
    %121 = vector.multi_reduction <add>, %120, %cst_43 [1] : vector<64x64xf32> to vector<64xf32>
    %122 = vector.shape_cast %121 : vector<64xf32> to vector<64x1xf32>
    %cst_44 = arith.constant dense<0.000000e+00> : vector<64x4xf32>
    %123 = tpu.matmul %120, %97, %cst_44 {dimension_numbers = #tpu.dot_dimension_numbers<[1], [0], [0], [1], [0, 0, 1, 1], [], []>} : vector<64x64xf32>, vector<64x4xf32>, vector<64x4xf32> -> vector<64x4xf32>
    %cst_45 = arith.constant 9.000000e-15 : f32
    %124 = vector.broadcast %cst_45 : f32 to vector<64x1xf32>
    %125 = arith.addf %122, %124 : vector<64x1xf32>
    %126 = tpu.reciprocal %125 {approx = true} : vector<64x1xf32> -> vector<64x1xf32>
    %127 = vector.broadcast %126 : vector<64x1xf32> to vector<64x4xf32>
    %128 = arith.mulf %123, %127 : vector<64x4xf32>
    %129 = vector.extract_strided_slice %96 {offsets = [0, 4], sizes = [64, 4], strides = [1, 1]} : vector<64x12xf32> to vector<64x4xf32>
    %130 = vector.extract_strided_slice %96 {offsets = [0, 9], sizes = [64, 1], strides = [1, 1]} : vector<64x12xf32> to vector<64x1xf32>
    %131 = vector.extract_strided_slice %96 {offsets = [0, 11], sizes = [64, 1], strides = [1, 1]} : vector<64x12xf32> to vector<64x1xf32>
    %132 = tpu.transpose %131, [1, 0] : vector<64x1xf32> -> vector<1x64xf32>
    %133 = vector.broadcast %130 : vector<64x1xf32> to vector<64x64xf32>
    %134 = vector.broadcast %132 : vector<1x64xf32> to vector<64x64xf32>
    %135 = arith.addf %133, %134 : vector<64x64xf32>
    %cst_46 = arith.constant 0.000000e+00 : f32
    %136 = vector.broadcast %cst_46 : f32 to vector<64x64xf32>
    %137 = arith.cmpf ogt, %135, %136 : vector<64x64xf32>
    %cst_47 = arith.constant 2.000000e-01 : f32
    %138 = vector.broadcast %cst_47 : f32 to vector<64x64xf32>
    %139 = arith.mulf %138, %135 : vector<64x64xf32>
    %140 = arith.select %137, %135, %139 : vector<64x64xi1>, vector<64x64xf32>
    %cst_48 = arith.constant 0.000000e+00 : f32
    %141 = vector.broadcast %cst_48 : f32 to vector<64x64xf32>
    %142 = arith.cmpf ogt, %1, %141 : vector<64x64xf32>
    %cst_49 = arith.constant -1.000000e+30 : f32
    %143 = vector.broadcast %cst_49 : f32 to vector<64x64xf32>
    %144 = arith.select %142, %140, %143 : vector<64x64xi1>, vector<64x64xf32>
    %cst_50 = arith.constant dense<0xFF800000> : vector<64xf32>
    %145 = vector.multi_reduction <maximumf>, %144, %cst_50 [1] : vector<64x64xf32> to vector<64xf32>
    %146 = vector.shape_cast %145 : vector<64xf32> to vector<64x1xf32>
    %147 = vector.broadcast %146 : vector<64x1xf32> to vector<64x64xf32>
    %148 = arith.subf %140, %147 : vector<64x64xf32>
    %cst_51 = arith.constant 0.000000e+00 : f32
    %149 = vector.broadcast %cst_51 : f32 to vector<64x64xf32>
    %150 = arith.minimumf %148, %149 : vector<64x64xf32>
    %151 = math.exp %150 : vector<64x64xf32>
    %152 = arith.mulf %1, %151 : vector<64x64xf32>
    %cst_52 = arith.constant dense<0.000000e+00> : vector<64xf32>
    %153 = vector.multi_reduction <add>, %152, %cst_52 [1] : vector<64x64xf32> to vector<64xf32>
    %154 = vector.shape_cast %153 : vector<64xf32> to vector<64x1xf32>
    %cst_53 = arith.constant dense<0.000000e+00> : vector<64x4xf32>
    %155 = tpu.matmul %152, %129, %cst_53 {dimension_numbers = #tpu.dot_dimension_numbers<[1], [0], [0], [1], [0, 0, 1, 1], [], []>} : vector<64x64xf32>, vector<64x4xf32>, vector<64x4xf32> -> vector<64x4xf32>
    %cst_54 = arith.constant 9.000000e-15 : f32
    %156 = vector.broadcast %cst_54 : f32 to vector<64x1xf32>
    %157 = arith.addf %154, %156 : vector<64x1xf32>
    %158 = tpu.reciprocal %157 {approx = true} : vector<64x1xf32> -> vector<64x1xf32>
    %159 = vector.broadcast %158 : vector<64x1xf32> to vector<64x4xf32>
    %160 = arith.mulf %155, %159 : vector<64x4xf32>
    %161 = arith.addf %128, %160 : vector<64x4xf32>
    %cst_55 = arith.constant 5.000000e-01 : f32
    %162 = vector.broadcast %cst_55 : f32 to vector<64x4xf32>
    %163 = arith.mulf %161, %162 : vector<64x4xf32>
    %cst_56 = arith.constant 0.000000e+00 : f32
    %164 = vector.broadcast %cst_56 : f32 to vector<64x4xf32>
    %165 = arith.cmpf ogt, %163, %164 : vector<64x4xf32>
    %cst_57 = arith.constant 0.000000e+00 : f32
    %166 = vector.broadcast %cst_57 : f32 to vector<64x4xf32>
    %167 = arith.minimumf %163, %166 : vector<64x4xf32>
    %168 = math.exp %167 : vector<64x4xf32>
    %cst_58 = arith.constant 1.000000e+00 : f32
    %169 = vector.broadcast %cst_58 : f32 to vector<64x4xf32>
    %170 = arith.subf %168, %169 : vector<64x4xf32>
    %171 = arith.select %165, %163, %170 : vector<64x4xi1>, vector<64x4xf32>
    %cst_59 = arith.constant dense<0xFF800000> : vector<64xf32>
    %172 = vector.multi_reduction <maximumf>, %171, %cst_59 [1] : vector<64x4xf32> to vector<64xf32>
    %173 = vector.shape_cast %172 : vector<64xf32> to vector<64x1xf32>
    %174 = vector.broadcast %173 : vector<64x1xf32> to vector<64x4xf32>
    %175 = arith.subf %171, %174 : vector<64x4xf32>
    %176 = math.exp %175 : vector<64x4xf32>
    %cst_60 = arith.constant dense<0.000000e+00> : vector<64xf32>
    %177 = vector.multi_reduction <add>, %176, %cst_60 [1] : vector<64x4xf32> to vector<64xf32>
    %178 = vector.shape_cast %177 : vector<64xf32> to vector<64x1xf32>
    %179 = math.log %178 : vector<64x1xf32>
    %180 = vector.broadcast %173 : vector<64x1xf32> to vector<64x4xf32>
    %181 = arith.subf %171, %180 : vector<64x4xf32>
    %182 = vector.broadcast %179 : vector<64x1xf32> to vector<64x4xf32>
    %183 = arith.subf %181, %182 : vector<64x4xf32>
    %c0_61 = arith.constant 0 : index
    %c0_62 = arith.constant 0 : index
    %184 = vector.load %arg6[%c0_61, %c0_62] : memref<64x4xf32, #tpu.memory_space<vmem>>, vector<64x4xf32>
    tpu.vector_store %arg6[%c0_61, %c0_62], %183 {strides = array<i32>} : memref<64x4xf32, #tpu.memory_space<vmem>>, vector<64x4xf32>,
    return
  }
}

</mosaic_0001>

<bundles_post_ra>
// kernel: spagat_forward.1
= control target key start
LH: loop header
LB: loop body
LE: loop exit
PB: predicated region body
PF: predicated region fallthrough
CT: control target
= control target key end

     0   :  { %vm56_vm0 = vcmask 130048   ;;  %v3021_v11 = vmov 17   ;;  %v3022_v12 = vmov 16   ;;  %s3023_s18 = smov 109   ;;  %vm334_vm2 = vcmask 523264   ;;  %s3029_s7 = smov 118   ;;  %s3919_s2 = inlined_call_operand.vmem [shape: f32[16,20], index: 2, kind: input, shape index: {}]   ;;  %s3920_s0 = inlined_call_operand.vmem [shape: f32[64,16], index: 0, kind: input, shape index: {}]   ;;  %s3921_s3 = inlined_call_operand.vmem [shape: f32[1,20], index: 3, kind: input, shape index: {}]   ;;  %s3922_s1 = inlined_call_operand.vmem [shape: bf16[64,64], index: 1, kind: input, shape index: {}]   ;;  %s3923_s4 = inlined_call_operand.vmem [shape: f32[16,12], index: 4, kind: input, shape index: {}]   ;;  %s3924_s5 = inlined_call_operand.vmem [shape: f32[1,12], index: 5, kind: input, shape index: {}]   ;;  %s3925_s6 = inlined_call_operand.vmem [shape: f32[64,4], index: 6, kind: output, shape index: {}]  }
   0x1   :  { %v47_v0 = vld [vmem:[%s3919_s2] sm:$0xff]  ;;  %v48_v1 = vld [vmem:[%s3919_s2 + $0x8] sm:$0xff]  ;;  %v41_v5 = vld [vmem:[%s3920_s0 + $0x10] sm:$0xff]  ;;  %2749 = vset.pattern.permute.xlu0 %v3021_v11  ;;  %2748 = vset.pattern.permute.xlu1 %v3022_v12  ;;  %s3028_s2 = smov 117  }
   0x2   :  { %v39_v2 = vld [vmem:[%s3920_s0] sm:$0xff]  ;;  %v2653_v3 = vpack.c.bf16 %v48_v1, %v47_v0  ;;  %v40_v4 = vld [vmem:[%s3920_s0 + $0x8] sm:$0xff]  ;;  %v42_v6 = vld [vmem:[%s3920_s0 + $0x18] sm:$0xff] }
   0x3   :  { %2501 = vmatprep.mubr.msk.f32.mxu0 %vm56_vm0, %v39_v2  ;;  %v43_v7 = vld [vmem:[%s3920_s0 + $0x20] sm:$0xff]  ;;  %v44_v8 = vld [vmem:[%s3920_s0 + $0x28] sm:$0xff]  ;;  %v45_v9 = vld [vmem:[%s3920_s0 + $0x30] sm:$0xff] }
   0x4   :  { %2654 = vmatprep.subr.bf16.mxu0 %v2653_v3  ;;  %v46_v10 = vld [vmem:[%s3920_s0 + $0x38] sm:$0xff]  ;;  %v2304_v13 = vld [vmem:[%s3921_s3] ss:$0 sm:$0xff]  ;;  %s3024_s0 = smov 110   ;;  %s3025_s3 = smov 120  }
   0x5   :  { %2656 = vmatpush3.bf16.msra.mxu0 %v2653_v3 }
   0x8   :  { %2502 = vmatmul.mubr.msk.f32.vlgmr.msra.gmra.mrb[0].mxu0 %vm56_vm0, %v40_v4 }
   0x9   :  { %2504 = vmatprep.mubr.msk.f32.mxu0 %vm56_vm0, %v41_v5 }
   0xc   :  { %2505 = vmatmul.mubr.msk.f32.gmra.mrb[2].mxu0 %vm56_vm0, %v42_v6 }
   0xd   :  { %2507 = vmatprep.mubr.msk.f32.mxu0 %vm56_vm0, %v43_v7 }
  0x10   :  { %2508 = vmatmul.mubr.msk.f32.gmra.mrb[4].mxu0 %vm56_vm0, %v44_v8  ;;  %v282_v8 = vlaneseq }
  0x11   :  { %2510 = vmatprep.mubr.msk.f32.mxu0 %vm56_vm0, %v45_v9 }
  0x12   :  { %v283_v9 = vshrl.u32 %v282_v8, 7 }
  0x14   :  { %2511 = vmatmul.mubr.msk.f32.gmra.mrb[6].mxu0 %vm56_vm0, %v46_v10 }
  0xdb   :  { %v2503_v14 = vpop.f32.mrb[0].mxu0 }
  0xdc   :  { %v153_v15 = vadd.f32 %v2503_v14, %v2304_v13  ;;  %v147_v16 = vpop.f32.mrb[1].mxu0  ;;  %v2402_v14 = vld [vmem:[%s3922_s1 + $0x8] sm:$0xff]  }
  0xdd   :  { %v148_v17 = vadd.f32 %v2304_v13, %v147_v16 }
  0xde   :  { %626 = vrot.lane.b32.xlu1 %v153_v15, %s3023_s18  ;;  %196 = vrot.lane.b32.xlu0 %v153_v15, %s3024_s0 }
  0xdf   :  { %v2657_v18 = vpack.c.bf16 %v153_v15, %v148_v17  ;;  %v2506_v19 = vpop.f32.mrb[2].mxu0  ;;  %v2752_v20 = vpack.i.bf16 %v153_v15, %v148_v17 }
  0xe0   :  { %v3111_v21 = vadd.f32 %v2506_v19, %v2304_v13  ;;  %v157_v22 = vpop.f32.mrb[3].mxu0 }
  0xe1   :  { %2658 = vmatprep.subr.bf16.mxu1 %v2657_v18  ;;  %v3113_v23 = vadd.f32 %v2304_v13, %v157_v22 }
  0xe2   :  { %255 = vperm.xlu1 %2748, %v153_v15   ;;  %685 = vperm.xlu0 %2749, %v153_v15  }
  0xe3   :  { %2660 = vmatpush3.bf16.msra.mxu1 %v2657_v18  ;;  %v2661_v24 = vpack.c.bf16 %v3111_v21, %v3113_v23  ;;  %v2509_v25 = vpop.f32.mrb[4].mxu0  ;;  %v2765_v26 = vpack.i.bf16 %v3111_v21, %v3113_v23 }
  0xe4   :  { %v167_v27 = vpop.f32.mrb[5].mxu0  ;;  %v3119_v28 = vadd.f32 %v2509_v25, %v2304_v13 }
  0xe5   :  { %2662 = vmatprep.subr.bf16.mxu1 %v2661_v24  ;;  %v3121_v29 = vadd.f32 %v2304_v13, %v167_v27 }
  0xe6   :  { %2751 = vset.pattern.permute.xlu1 %v3021_v11  ;;  %194 = vrot.lane.b32.xlu0 %v148_v17, %s3024_s0 }
  0xe7   :  { %681 = vperm.xlu1 %2751, %v148_v17   ;;  %2750 = vset.pattern.permute.xlu0 %v3022_v12  ;;  %v2665_v30 = vpack.c.bf16 %v3119_v28, %v3121_v29  ;;  %v2512_v31 = vpop.f32.mrb[6].mxu0  ;;  %v2770_v32 = vpack.i.bf16 %v3119_v28, %v3121_v29 }
  0xe8   :  { %2664 = vmatpush3.bf16.msra.mxu1 %v2661_v24  ;;  %v177_v33 = vpop.f32.mrb[7].mxu0  ;;  %v3130_v34 = vadd.f32 %v2512_v31, %v2304_v13  ;;  %v3233_v24 = vunpack.c.h.bf16 %v2402_v14 }
  0xe9   :  { %2666 = vmatprep.subr.bf16.mxu1 %v2665_v30  ;;  %v3132_v35 = vadd.f32 %v2304_v13, %v177_v33  ;;  %v3212_v13 = vld [vmem:[%s3922_s1 + $0x18] sm:$0xff]  }
  0xea   :  { %624 = vrot.lane.b32.xlu0 %v148_v17, %s3023_s18  ;;  %v3224_v19 = vunpack.c.l.bf16 %v3212_v13  ;;  %vm321_vm12 = vcmp.gt.f32.partialorder %v3233_v24, 0.0 }
  0xeb   :  { %2753 = vrot.lane.b32.xlu1 %v2752_v20, %s3025_s3  ;;  %v2669_v36 = vpack.c.bf16 %v3130_v34, %v3132_v35  ;;  %v2775_v37 = vpack.i.bf16 %v3130_v34, %v3132_v35  ;;  %v3226_v20 = vunpack.c.l.bf16 %v2402_v14 }
  0xec   :  { %2668 = vmatpush3.bf16.msra.mxu1 %v2665_v30  ;;  %vm324_vm4 = vcmp.gt.f32.partialorder %v3224_v19, 0.0 }
  0xed   :  { %2670 = vmatprep.subr.bf16.mxu1 %v2669_v36  ;;  %vm320_vm5 = vcmp.gt.f32.partialorder %v3226_v20, 0.0 }
  0xee   :  { %251 = vperm.xlu0 %2750, %v148_v17  }
  0xef   :  { %200 = vrot.lane.b32.xlu1 %v3111_v21, %s3024_s0 }
  0xf0   :  { %2672 = vmatpush3.bf16.msra.mxu1 %v2669_v36 }
  0xf2   :  { %263 = vperm.xlu0 %2750, %v3111_v21  }
  0xf3   :  { %630 = vrot.lane.b32.xlu1 %v3111_v21, %s3023_s18 }
  0xf6   :  { %628 = vrot.lane.b32.xlu0 %v3113_v23, %s3023_s18 }
  0xf7   :  { %693 = vperm.xlu1 %2751, %v3111_v21  }
  0xfa   :  { %271 = vperm.xlu0 %2750, %v3119_v28  }
  0xfb   :  { %198 = vrot.lane.b32.xlu1 %v3113_v23, %s3024_s0 }
  0xfc   :  { %2757 = vset.pattern.permute.xlu1 %v3022_v12 }
  0xfe   :  { %202 = vrot.lane.b32.xlu0 %v3121_v29, %s3024_s0 }
  0xff   :  { %259 = vperm.xlu1 %2757, %v3113_v23   ;;  %2760 = vset.pattern.permute.xlu0 %v3021_v11 }
 0x102   :  { %632 = vrot.lane.b32.xlu0 %v3121_v29, %s3023_s18 }
 0x103   :  { %2758 = vset.pattern.permute.xlu1 %v3021_v11 }
 0x104   :  { %689 = vperm.xlu1 %2758, %v3113_v23  }
 0x106   :  { %697 = vperm.xlu0 %2760, %v3121_v29  }
 0x108   :  { %204 = vrot.lane.b32.xlu1 %v3119_v28, %s3024_s0 }
 0x10a   :  { %2761 = vset.pattern.permute.xlu0 %v3022_v12 }
 0x10b   :  { %279 = vperm.xlu0 %2761, %v3130_v34  }
 0x10c   :  { %634 = vrot.lane.b32.xlu1 %v3119_v28, %s3023_s18 }
 0x10f   :  { %206 = vrot.lane.b32.xlu0 %v3132_v35, %s3024_s0 }
 0x110   :  { %701 = vperm.xlu1 %2758, %v3119_v28  }
 0x113   :  { %636 = vrot.lane.b32.xlu0 %v3132_v35, %s3023_s18 }
 0x114   :  { %2759 = vset.pattern.permute.xlu1 %v3022_v12 }
 0x115   :  { %267 = vperm.xlu1 %2759, %v3121_v29  }
 0x119   :  { %208 = vrot.lane.b32.xlu1 %v3130_v34, %s3024_s0 }
 0x11a   :  { %2762 = vset.pattern.permute.xlu1 %v3021_v11 }
 0x11d   :  { %638 = vrot.lane.b32.xlu1 %v3130_v34, %s3023_s18 }
 0x121   :  { %709 = vperm.xlu1 %2762, %v3130_v34  }
 0x125   :  { %2763 = vset.pattern.permute.xlu1 %v3022_v12  ;;  %v3207_v12 = vsub.s32 0, %v283_v9 }
 0x126   :  { %275 = vperm.xlu1 %2763, %v3132_v35  }
 0x12a   :  { %2764 = vset.pattern.permute.xlu1 %v3021_v11  ;;  %v2387_v11 = vld [vmem:[%s3922_s1] sm:$0xff]  }
 0x12b   :  { %705 = vperm.xlu1 %2764, %v3132_v35   ;;  %v3217_v15 = vunpack.c.h.bf16 %v2387_v11  ;;  %v3219_v16 = vunpack.c.l.bf16 %v2387_v11 }
 0x12d   :  { %vm319_vm1 = vcmp.gt.f32.partialorder %v3217_v15, 0.0  ;;  %vm318_vm3 = vcmp.gt.f32.partialorder %v3219_v16, 0.0 }
 0x150   :  { %v627_v38 = vpop.permute.xlu1 %626  ;;  %v197_v39 = vpop.permute.xlu0 %196 }
 0x161   :  { %v3184_v40 = vpop.permute.xlu1 %255  ;;  %v3186_v41 = vpop.permute.xlu0 %685 }
 0x165   :  { %v195_v42 = vpop.permute.xlu0 %194 }
 0x166   :  { %v3188_v43 = vpop.permute.xlu1 %681  ;;  %218 = vxpose.xlu0.b32.start [1/8] (short) (narrow) %v195_v42, 8 }
 0x169   :  { %v625_v44 = vpop.permute.xlu0 %624 }
 0x16a   :  { %v2754_v45 = vpop.permute.xlu1 %2753  ;;  %219 = vxpose.xlu0.b32.cont [2/8] (short) (narrow) %v197_v39, 8  ;;  %648 = vxpose.xlu1.b32.start [1/8] (short) (narrow) %v625_v44, 8 }
 0x16b   :  { %v2756_v46 = vunpack.i.h.bf16 %v2754_v45  ;;  %v2755_v47 = vunpack.i.l.bf16 %v2754_v45 }
 0x16d   :  { %v252_v48 = vpop.permute.xlu0 %251  ;;  %v2673_v49 = vpack.c.bf16 %v2756_v46, %v2755_v47 }
 0x16e   :  { %v201_v50 = vpop.permute.xlu1 %200  ;;  %649 = vxpose.xlu1.b32.cont [2/8] (short) (narrow) %v627_v38, 8 }
 0x16f   :  { %2674 = vmatprep.subr.bf16.mxu0 %v2673_v49 }
 0x170   :  { %2676 = vmatpush3.bf16.msra.mxu0 %v2673_v49 }
 0x171   :  { %v264_v51 = vpop.permute.xlu0 %263 }
 0x172   :  { %v631_v52 = vpop.permute.xlu1 %630 }
 0x175   :  { %v629_v53 = vpop.permute.xlu0 %628 }
 0x176   :  { %v3190_v54 = vpop.permute.xlu1 %693  ;;  %650 = vxpose.xlu1.b32.cont [3/8] (short) (narrow) %v629_v53, 8 }
 0x179   :  { %v3192_v55 = vpop.permute.xlu0 %271 }
 0x17a   :  { %v199_v56 = vpop.permute.xlu1 %198  ;;  %651 = vxpose.xlu1.b32.cont [4/8] (short) (narrow) %v631_v52, 8 }
 0x17b   :  { %220 = vxpose.xlu0.b32.cont [3/8] (short) (narrow) %v199_v56, 8 }
 0x17d   :  { %v203_v57 = vpop.permute.xlu0 %202 }
 0x17e   :  { %v260_v58 = vpop.permute.xlu1 %259 }
 0x17f   :  { %221 = vxpose.xlu0.b32.cont [4/8] (short) (narrow) %v201_v50, 8 }
 0x181   :  { %v633_v59 = vpop.permute.xlu0 %632 }
 0x182   :  { %652 = vxpose.xlu1.b32.cont [5/8] (short) (narrow) %v633_v59, 8 }
 0x183   :  { %v3194_v60 = vpop.permute.xlu1 %689  ;;  %222 = vxpose.xlu0.b32.cont [5/8] (short) (narrow) %v203_v57, 8 }
 0x185   :  { %v3196_v61 = vpop.permute.xlu0 %697 }
 0x187   :  { %v205_v62 = vpop.permute.xlu1 %204 }
 0x188   :  { %223 = vxpose.xlu0.b32.cont [6/8] (short) (narrow) %v205_v62, 8 }
 0x18a   :  { %v3198_v63 = vpop.permute.xlu0 %279 }
 0x18b   :  { %v635_v0 = vpop.permute.xlu1 %634 }
 0x18c   :  { %653 = vxpose.xlu1.b32.cont [6/8] (short) (narrow) %v635_v0, 8 }
 0x18e   :  { %v207_v1 = vpop.permute.xlu0 %206 }
 0x18f   :  { %v3200_v2 = vpop.permute.xlu1 %701  ;;  %224 = vxpose.xlu0.b32.cont [7/8] (short) (narrow) %v207_v1, 8 }
 0x192   :  { %v637_v3 = vpop.permute.xlu0 %636 }
 0x193   :  { %654 = vxpose.xlu1.b32.cont [7/8] (short) (narrow) %v637_v3, 8 }
 0x194   :  { %v268_v4 = vpop.permute.xlu1 %267 }
 0x198   :  { %v209_v5 = vpop.permute.xlu1 %208 }
 0x199   :  { %225 = vxpose.xlu0.b32.end [8/8] (short) (narrow) %v209_v5, 8 }
 0x19c   :  { %v639_v6 = vpop.permute.xlu1 %638 }
 0x19d   :  { %655 = vxpose.xlu1.b32.end [8/8] (short) (narrow) %v639_v6, 8 }
 0x1a0   :  { %v3202_v7 = vpop.permute.xlu1 %709 }
 0x1a5   :  { %v276_v10 = vpop.permute.xlu1 %275 }
 0x1aa   :  { %v3221_v17 = vpop.permute.xlu1 %705 }
 0x1fd   :  { %v234_v18 = vpop.trf.xlu0 }
 0x1fe   :  { %v3229_v22 = vrot.slane %v234_v18, %v3207_v12 }
 0x200   :  { %v287_v25 = vadd.f32 %v3229_v22, %v3184_v40  ;;  %v286_v27 = vadd.f32 %v3229_v22, %v252_v48  ;;  %v292_v30 = vadd.f32 %v3229_v22, %v276_v10  ;;  %v288_v31 = vadd.f32 %v3229_v22, %v260_v58  ;;  %v2403_v48 = vld [vmem:[%s3922_s1 + $0x10] sm:$0xff]  }
 0x201   :  { %v664_v33 = vpop.trf.xlu1  ;;  %v289_v36 = vadd.f32 %v3229_v22, %v264_v51  ;;  %v290_v38 = vadd.f32 %v3229_v22, %v268_v4  ;;  %v3272_v59 = vunpack.c.l.bf16 %v2403_v48  ;;  %v291_v3 = vadd.f32 %v3229_v22, %v3192_v55 }
 0x202   :  { %v3245_v39 = vrot.slane %v664_v33, %v3207_v12  ;;  %vm295_vm6 = vcmp.gt.f32.partialorder %v287_v25, 0.0  ;;  %v303_v40 = vmul.f32 0.2, %v287_v25  ;;  %vm294_vm7 = vcmp.gt.f32.partialorder %v286_v27, 0.0 }
 0x203   :  { %v302_v42 = vmul.f32 0.2, %v286_v27  ;;  %vm300_vm8 = vcmp.gt.f32.partialorder %v292_v30, 0.0  ;;  %v308_v44 = vmul.f32 0.2, %v292_v30  ;;  %vm296_vm9 = vcmp.gt.f32.partialorder %v288_v31, 0.0 }
 0x204   :  { %v3247_v45 = vsel %vm295_vm6, %v287_v25, %v303_v40  ;;  %v304_v46 = vmul.f32 0.2, %v288_v31  ;;  %v716_v47 = vadd.f32 %v3245_v39, %v3188_v43  ;;  %vm297_vm10 = vcmp.gt.f32.partialorder %v289_v36, 0.0 }
 0x205   :  { %v327_v49 = vsel %vm319_vm1, %v3247_v45, -1e+30  ;;  %v3257_v50 = vsel %vm294_vm7, %v286_v27, %v302_v42  ;;  %v3259_v51 = vsel %vm300_vm8, %v292_v30, %v308_v44  ;;  %v305_v52 = vmul.f32 0.2, %v289_v36 }
 0x206   :  { %v338_v53 = vsel %vm334_vm2, %v327_v49, -inf  ;;  %v326_v43 = vsel %vm318_vm3, %v3257_v50, -1e+30  ;;  %v332_v56 = vsel %vm324_vm4, %v3259_v51, -1e+30  ;;  %v3268_v57 = vsel %vm296_vm9, %v288_v31, %v304_v46 }
 0x207   :  { %339 = vmax.xlane.f32.xlu1 %v338_v53  ;;  %v335_v58 = vsel %vm334_vm2, %v326_v43, -inf  ;;  %vm724_vm11 = vcmp.gt.f32.partialorder %v716_v47, 0.0  ;;  %v328_v62 = vsel %vm320_vm5, %v3268_v57, -1e+30  ;;  %v732_v0 = vmul.f32 0.2, %v716_v47 }
 0x208   :  { %336 = vmax.xlane.f32.xlu0 %v335_v58  ;;  %v718_v1 = vadd.f32 %v3245_v39, %v3194_v60  ;;  %v353_v4 = vsel %vm334_vm2, %v332_v56, -inf  ;;  %v3283_v5 = vsel %vm297_vm10, %v289_v36, %v305_v52  ;;  %v306_v6 = vmul.f32 0.2, %v290_v38 }
 0x209   :  { %v720_v8 = vadd.f32 %v3245_v39, %v3196_v61  ;;  %v3287_v9 = vsel %vm724_vm11, %v716_v47, %v732_v0  ;;  %vm298_vm14 = vcmp.gt.f32.partialorder %v290_v38, 0.0  ;;  %v341_v60 = vsel %vm334_vm2, %v328_v62, -inf }
 0x20a   :  { %vm726_vm13 = vcmp.gt.f32.partialorder %v718_v1, 0.0  ;;  %v734_v10 = vmul.f32 0.2, %v718_v1  ;;  %v748_v55 = vsel %vm318_vm3, %v3287_v9, -1e+30  ;;  %v3293_v11 = vunpack.c.h.bf16 %v2403_v48 }
 0x20b   :  { %354 = vmax.xlane.f32.xlu1 %v353_v4  ;;  %v329_v14 = vsel %vm321_vm12, %v3283_v5, -1e+30  ;;  %vm322_vm15 = vcmp.gt.f32.partialorder %v3272_v59, 0.0  ;;  %v736_v18 = vmul.f32 0.2, %v720_v8  ;;  %v3301_v25 = vsel %vm298_vm14, %v290_v38, %v306_v6 }
 0x20c   :  { %342 = vmax.xlane.f32.xlu0 %v341_v60  ;;  %v3298_v61 = vsel %vm726_vm13, %v718_v1, %v734_v10  ;;  %vm728_vm0 = vcmp.gt.f32.partialorder %v720_v8, 0.0  ;;  %v307_v27 = vmul.f32 0.2, %v291_v3  ;;  %v293_v30 = vadd.f32 %v3229_v22, %v3198_v63 }
 0x20d   :  { %v756_v31 = vsel %vm334_vm2, %v748_v55, -inf  ;;  %vm299_vm6 = vcmp.gt.f32.partialorder %v291_v3, 0.0  ;;  %v722_v33 = vadd.f32 %v3245_v39, %v3221_v17  ;;  %v344_v36 = vsel %vm334_vm2, %v329_v14, -inf }
 0x20e   :  { %v750_v40 = vsel %vm320_vm5, %v3298_v61, -1e+30  ;;  %v3313_v38 = vunpack.c.h.bf16 %v3212_v13  ;;  %v330_v63 = vsel %vm322_vm15, %v3301_v25, -1e+30  ;;  %v3318_v22 = vsel %vm728_vm0, %v720_v8, %v736_v18 }
 0x20f   :  { %757 = vmax.xlane.f32.xlu1 %v756_v31  ;;  %vm323_vm7 = vcmp.gt.f32.partialorder %v3293_v11, 0.0  ;;  %v738_v17 = vmul.f32 0.2, %v722_v33  ;;  %v3321_v42 = vsel %vm299_vm6, %v291_v3, %v307_v27  ;;  %vm730_vm8 = vcmp.gt.f32.partialorder %v722_v33, 0.0 }
 0x210   :  { %345 = vmax.xlane.f32.xlu0 %v344_v36  ;;  %v309_v44 = vmul.f32 0.2, %v293_v30  ;;  %v717_v46 = vadd.f32 %v3245_v39, %v3186_v41  ;;  %v762_v13 = vsel %vm334_vm2, %v750_v40, -inf  ;;  %vm301_vm9 = vcmp.gt.f32.partialorder %v293_v30, 0.0 }
 0x211   :  { %v347_v47 = vsel %vm334_vm2, %v330_v63, -inf  ;;  %v752_v48 = vsel %vm322_vm15, %v3318_v22, -1e+30  ;;  %v331_v49 = vsel %vm323_vm7, %v3321_v42, -1e+30  ;;  %v3333_v52 = vsel %vm730_vm8, %v722_v33, %v738_v17 }
 0x212   :  { %v3335_v53 = vsel %vm301_vm9, %v293_v30, %v309_v44  ;;  %vm325_vm10 = vcmp.gt.f32.partialorder %v3313_v38, 0.0  ;;  %v733_v41 = vmul.f32 0.2, %v717_v46  ;;  %v719_v43 = vadd.f32 %v3245_v39, %v3190_v54 }
 0x213   :  { %763 = vmax.xlane.f32.xlu1 %v762_v13  ;;  %v768_v56 = vsel %vm334_vm2, %v752_v48, -inf  ;;  %vm725_vm11 = vcmp.gt.f32.partialorder %v717_v46, 0.0  ;;  %v350_v58 = vsel %vm334_vm2, %v331_v49, -inf  ;;  %v754_v62 = vsel %vm324_vm4, %v3333_v52, -1e+30 }
 0x214   :  { %348 = vmax.xlane.f32.xlu0 %v347_v47  ;;  %v333_v0 = vsel %vm325_vm10, %v3335_v53, -1e+30  ;;  %v3348_v1 = vsel %vm725_vm11, %v717_v46, %v733_v41  ;;  %v735_v3 = vmul.f32 0.2, %v719_v43  ;;  %v721_v54 = vadd.f32 %v3245_v39, %v3200_v2 }
 0x215   :  { %v774_v4 = vsel %vm334_vm2, %v754_v62, -inf  ;;  %vm727_vm13 = vcmp.gt.f32.partialorder %v719_v43, 0.0  ;;  %v356_v6 = vsel %vm334_vm2, %v333_v0, -inf  ;;  %v749_v8 = vsel %vm319_vm1, %v3348_v1, -1e+30 }
 0x216   :  { %v3357_v10 = vsel %vm727_vm13, %v719_v43, %v735_v3  ;;  %v737_v60 = vmul.f32 0.2, %v721_v54  ;;  %v723_v55 = vadd.f32 %v3245_v39, %v3202_v7  ;;  %vm729_vm14 = vcmp.gt.f32.partialorder %v721_v54, 0.0 }
 0x217   :  { %769 = vmax.xlane.f32.xlu1 %v768_v56  ;;  %v759_v2 = vsel %vm334_vm2, %v749_v8, -inf  ;;  %v751_v14 = vsel %vm321_vm12, %v3357_v10, -1e+30  ;;  %vm1072_vm6 = vcmask 64512  }
 0x218   :  { %351 = vmax.xlane.f32.xlu0 %v350_v58  ;;  %v3365_v18 = vsel %vm729_vm14, %v721_v54, %v737_v60  ;;  %v739_v27 = vmul.f32 0.2, %v723_v55  ;;  %vm731_vm0 = vcmp.gt.f32.partialorder %v723_v55, 0.0  ;;  %v765_v30 = vsel %vm334_vm2, %v751_v14, -inf }
 0x219   :  { %v753_v31 = vsel %vm323_vm7, %v3365_v18, -1e+30 }
 0x21a   :  { %v3371_v7 = vsel %vm731_vm0, %v723_v55, %v739_v27  ;;  %v771_v39 = vsel %vm334_vm2, %v753_v31, -inf }
 0x21b   :  { %775 = vmax.xlane.f32.xlu1 %v774_v4  ;;  %v755_v33 = vsel %vm325_vm10, %v3371_v7, -1e+30 }
 0x21c   :  { %357 = vmax.xlane.f32.xlu0 %v356_v6  ;;  %v777_v36 = vsel %vm334_vm2, %v755_v33, -inf }
 0x220   :  { %760 = vmax.xlane.f32.xlu0 %v759_v2 }
 0x224   :  { %766 = vmax.xlane.f32.xlu0 %v765_v30 }
 0x228   :  { %772 = vmax.xlane.f32.xlu0 %v771_v39 }
 0x22c   :  { %778 = vmax.xlane.f32.xlu0 %v777_v36  ;;  %2771 = vrot.lane.b32.xlu1 %v2770_v32, %s3025_s3 }
 0x230   :  { %2776 = vrot.lane.b32.xlu1 %v2775_v37, %s3025_s3 }
 0x242   :  { %2766 = vrot.lane.b32.xlu0 %v2765_v26, %s3025_s3 }
 0x294   :  { %v340_v40 = vpop.xlane.xlu1 %339 }
 0x295   :  { %v360_v63 = vsub.f32 %v3247_v45, %v340_v40  ;;  %v337_v17 = vpop.xlane.xlu0 %336 }
 0x296   :  { %v359_v44 = vsub.f32 %v3257_v50, %v337_v17 }
 0x297   :  { %v368_v46 = vmin.f32 %v360_v63, 0.0 }
 0x298   :  { %v367_v13 = vmin.f32 %v359_v44, 0.0  ;;  %v355_v28 = vpop.xlane.xlu1 %354 }
 0x299   :  { %v377_v29 = vmul.f32 1.442695, %v368_v46  ;;  %v343_v32 = vpop.xlane.xlu0 %342  ;;  %v365_v35 = vsub.f32 %v3259_v51, %v355_v28 }
 0x29a   :  { %v375_v47 = vmul.f32 1.442695, %v367_v13  ;;  %v361_v34 = vsub.f32 %v3268_v57, %v343_v32 }
 0x29b   :  { %2813 = vpow2.f32 %v377_v29  ;;  %v373_v48 = vmin.f32 %v365_v35, 0.0 }
 0x29c   :  { %2815 = vpow2.f32 %v375_v47  ;;  %v369_v21 = vmin.f32 %v361_v34, 0.0  ;;  %v758_v23 = vpop.xlane.xlu1 %757 }
 0x29d   :  { %v780_v26 = vsub.f32 %v3287_v9, %v758_v23  ;;  %v346_v37 = vpop.xlane.xlu0 %345  ;;  %v387_v51 = vmul.f32 1.442695, %v373_v48 }
 0x29e   :  { %v379_v45 = vmul.f32 1.442695, %v369_v21  ;;  %v362_v50 = vsub.f32 %v3283_v5, %v346_v37 }
 0x29f   :  { %v788_v49 = vmin.f32 %v780_v26, 0.0 }
 0x2a0   :  { %2817 = vpow2.f32 %v379_v45  ;;  %v370_v41 = vmin.f32 %v362_v50, 0.0  ;;  %v764_v43 = vpop.xlane.xlu1 %763 }
 0x2a1   :  { %v796_v56 = vmul.f32 1.442695, %v788_v49  ;;  %v349_v58 = vpop.xlane.xlu0 %348  ;;  %v782_v0 = vsub.f32 %v3298_v61, %v764_v43 }
 0x2a2   :  { %v381_v57 = vmul.f32 1.442695, %v370_v41  ;;  %v363_v62 = vsub.f32 %v3301_v25, %v349_v58 }
 0x2a3   :  { %2819 = vpow2.f32 %v796_v56  ;;  %v790_v55 = vmin.f32 %v782_v0, 0.0 }
 0x2a4   :  { %2821 = vpow2.f32 %v381_v57  ;;  %v371_v9 = vmin.f32 %v363_v62, 0.0  ;;  %v770_v3 = vpop.xlane.xlu1 %769 }
 0x2a5   :  { %v2814_v54 = vpop.eup %2813  ;;  %v352_v4 = vpop.xlane.xlu0 %351  ;;  %2823 = vpow2.f32 %v387_v51  ;;  %v784_v2 = vsub.f32 %v3318_v22, %v770_v3  ;;  %v800_v22 = vmul.f32 1.442695, %v790_v55 }
 0x2a6   :  { %v2816_v5 = vpop.eup %2815  ;;  %v383_v6 = vmul.f32 1.442695, %v371_v9  ;;  %v364_v8 = vsub.f32 %v3321_v42, %v352_v4  ;;  %v392_v60 = vmul.f32 %v2814_v54, %v3217_v15 }
 0x2a7   :  { %v391_v25 = vmul.f32 %v2816_v5, %v3219_v16  ;;  %v792_v36 = vmin.f32 %v784_v2, 0.0 }
 0x2a8   :  { %2825 = vpow2.f32 %v383_v6  ;;  %v372_v14 = vmin.f32 %v364_v8, 0.0  ;;  %v776_v61 = vpop.xlane.xlu1 %775  ;;  %v402_v27 = vsel %vm334_vm2, %v392_v60, 0.0 }
 0x2a9   :  { %2529 = vmatprep.mubr.msk.f32.mxu1 %vm334_vm2, %v391_v25  ;;  %v358_v30 = vpop.xlane.xlu0 %357  ;;  %403 = vadd.xlane.f32.xlu1 %v402_v27  ;;  %v399_v31 = vsel %vm334_vm2, %v391_v25, 0.0  ;;  %v786_v40 = vsub.f32 %v3333_v52, %v776_v61  ;;  %v804_v47 = vmul.f32 1.442695, %v792_v36 }
 0x2aa   :  { %v2818_v42 = vpop.eup %2817  ;;  %v385_v39 = vmul.f32 1.442695, %v372_v14  ;;  %v366_v33 = vsub.f32 %v3335_v53, %v358_v30  ;;  %400 = vadd.xlane.f32.xlu0 %v399_v31  ;;  %2530 = vmatmul.mubr.msk.f32.vlgmr.msra.gmra.mrb[0].mxu1 %vm334_vm2, %v392_v60 }
 0x2ab   :  { %v393_v63 = vmul.f32 %v2818_v42, %v3226_v20  ;;  %v794_v52 = vmin.f32 %v786_v40, 0.0 }
 0x2ac   :  { %2827 = vpow2.f32 %v385_v39  ;;  %v374_v17 = vmin.f32 %v366_v33, 0.0  ;;  %v2772_v5 = vpop.permute.xlu1 %2771 }
 0x2ad   :  { %v2820_v44 = vpop.eup %2819  ;;  %v761_v46 = vpop.xlane.xlu0 %760  ;;  %2532 = vmatprep.mubr.msk.f32.mxu1 %vm334_vm2, %v393_v63  ;;  %v405_v13 = vsel %vm334_vm2, %v393_v63, 0.0  ;;  %2829 = vpow2.f32 %v800_v22  ;;  %v808_v50 = vmul.f32 1.442695, %v794_v52  ;;  %v2774_v42 = vunpack.i.h.bf16 %v2772_v5 }
 0x2ae   :  { %v2822_v28 = vpop.eup %2821  ;;  %v389_v29 = vmul.f32 1.442695, %v374_v17  ;;  %v781_v53 = vsub.f32 %v3348_v1, %v761_v46  ;;  %406 = vadd.xlane.f32.xlu0 %v405_v13  ;;  %v812_v32 = vmul.f32 %v2820_v44, %v3219_v16  ;;  %v2773_v39 = vunpack.i.l.bf16 %v2772_v5 }
 0x2af   :  { %v394_v34 = vmul.f32 %v2822_v28, %v3233_v24  ;;  %v2824_v21 = vpop.eup %2823 }
 0x2b0   :  { %2831 = vpow2.f32 %v389_v29  ;;  %v789_v35 = vmin.f32 %v781_v53, 0.0  ;;  %2557 = vmatprep.mubr.msk.f32.mxu0 %vm334_vm2, %v812_v32  ;;  %v397_v56 = vmul.f32 %v2824_v21, %v3224_v19  ;;  %v820_v25 = vsel %vm334_vm2, %v812_v32, 0.0  ;;  %v2777_v22 = vpop.permute.xlu1 %2776 }
 0x2b1   :  { %v767_v23 = vpop.xlane.xlu0 %766  ;;  %2533 = vmatmul.mubr.msk.f32.gmra.mrb[2].mxu1 %vm334_vm2, %v394_v34  ;;  %v408_v26 = vsel %vm334_vm2, %v394_v34, 0.0  ;;  %2833 = vpow2.f32 %v804_v47  ;;  %v2779_v13 = vunpack.i.h.bf16 %v2777_v22  ;;  %v2778_v28 = vunpack.i.l.bf16 %v2777_v22 }
 0x2b2   :  { %v2826_v37 = vpop.eup %2825  ;;  %v798_v1 = vmul.f32 1.442695, %v789_v35  ;;  %v783_v45 = vsub.f32 %v3357_v10, %v767_v23  ;;  %409 = vadd.xlane.f32.xlu0 %v408_v26  ;;  %v417_v3 = vsel %vm334_vm2, %v397_v56, 0.0  ;;  %v2681_v29 = vpack.c.bf16 %v2774_v42, %v2773_v39 }
 0x2b3   :  { %v395_v48 = vmul.f32 %v2826_v37, %v3272_v59  ;;  %v2685_v35 = vpack.c.bf16 %v2779_v13, %v2778_v28 }
 0x2b4   :  { %2835 = vpow2.f32 %v798_v1  ;;  %v791_v49 = vmin.f32 %v783_v45, 0.0 }
 0x2b5   :  { %v773_v41 = vpop.xlane.xlu0 %772  ;;  %2535 = vmatprep.mubr.msk.f32.mxu1 %vm334_vm2, %v395_v48  ;;  %v411_v43 = vsel %vm334_vm2, %v395_v48, 0.0  ;;  %2837 = vpow2.f32 %v808_v50  ;;  %v1069_v50 = vld [vmem:[%s3923_s4] sm:$0xff]  ;;  %v3460_v48 = vld [vmem:[%s3923_s4 + $0x8] sm:$0xff] }
 0x2b6   :  { %v2828_v58 = vpop.eup %2827  ;;  %v802_v57 = vmul.f32 1.442695, %v791_v49  ;;  %v785_v62 = vsub.f32 %v3365_v18, %v773_v41  ;;  %412 = vadd.xlane.f32.xlu1 %v411_v43  ;;  %2569 = vmatprep.subr.mxu1 %v1069_v50 }
 0x2b7   :  { %v396_v10 = vmul.f32 %v2828_v58, %v3293_v11  ;;  %v2830_v0 = vpop.eup %2829  ;;  %2570 = vmatpush3.msra.mxu1 %v1069_v50 }
 0x2b8   :  { %2839 = vpow2.f32 %v802_v57  ;;  %v793_v51 = vmin.f32 %v785_v62, 0.0  ;;  %v814_v61 = vmul.f32 %v2830_v0, %v3226_v20  ;;  %2583 = vmatprep.subr.mxu1 %v3460_v48 }
 0x2b9   :  { %v779_v9 = vpop.xlane.xlu0 %778  ;;  %2536 = vmatmul.mubr.msk.f32.gmra.mrb[4].mxu1 %vm334_vm2, %v396_v10  ;;  %v414_v54 = vsel %vm334_vm2, %v396_v10, 0.0 }
 0x2ba   :  { %v2832_v4 = vpop.eup %2831  ;;  %v806_v6 = vmul.f32 1.442695, %v793_v51  ;;  %v787_v8 = vsub.f32 %v3371_v7, %v779_v9  ;;  %418 = vadd.xlane.f32.xlu1 %v417_v3  ;;  %415 = vadd.xlane.f32.xlu0 %v414_v54  ;;  %v826_v63 = vsel %vm334_vm2, %v814_v61, 0.0 }
 0x2bb   :  { %2538 = vmatprep.mubr.msk.f32.mxu1 %vm334_vm2, %v397_v56  ;;  %v398_v18 = vmul.f32 %v2832_v4, %v3313_v38  ;;  %v2834_v55 = vpop.eup %2833 }
 0x2bc   :  { %2841 = vpow2.f32 %v806_v6  ;;  %v795_v60 = vmin.f32 %v787_v8, 0.0  ;;  %v816_v44 = vmul.f32 %v2834_v55, %v3272_v59 }
 0x2bd   :  { %v2767_v2 = vpop.permute.xlu0 %2766  ;;  %2539 = vmatmul.mubr.msk.f32.gmra.mrb[6].mxu1 %vm334_vm2, %v398_v18  ;;  %v420_v14 = vsel %vm334_vm2, %v398_v18, 0.0 }
 0x2be   :  { %v2836_v27 = vpop.eup %2835  ;;  %v810_v7 = vmul.f32 1.442695, %v795_v60  ;;  %v2769_v30 = vunpack.i.h.bf16 %v2767_v2  ;;  %v2768_v31 = vunpack.i.l.bf16 %v2767_v2  ;;  %821 = vadd.xlane.f32.xlu1 %v820_v25  ;;  %421 = vadd.xlane.f32.xlu0 %v420_v14  ;;  %v832_v32 = vsel %vm334_vm2, %v816_v44, 0.0 }
 0x2bf   :  { %v813_v33 = vmul.f32 %v2836_v27, %v3217_v15  ;;  %v2838_v40 = vpop.eup %2837 }
 0x2c0   :  { %2843 = vpow2.f32 %v810_v7  ;;  %v2677_v36 = vpack.c.bf16 %v2769_v30, %v2768_v31  ;;  %v818_v52 = vmul.f32 %v2838_v40, %v3224_v19 }
 0x2c1   :  { %v823_v17 = vsel %vm334_vm2, %v813_v33, 0.0 }
 0x2c2   :  { %v2840_v46 = vpop.eup %2839  ;;  %827 = vadd.xlane.f32.xlu1 %v826_v63  ;;  %824 = vadd.xlane.f32.xlu0 %v823_v17  ;;  %v838_v23 = vsel %vm334_vm2, %v818_v52, 0.0 }
 0x2c3   :  { %2678 = vmatprep.subr.bf16.mxu0 %v2677_v36  ;;  %v815_v53 = vmul.f32 %v2840_v46, %v3233_v24 }
 0x2c4   :  { %2680 = vmatpush3.bf16.msra.mxu0 %v2677_v36 }
 0x2c5   :  { %2682 = vmatprep.subr.bf16.mxu0 %v2681_v29  ;;  %v829_v47 = vsel %vm334_vm2, %v815_v53, 0.0 }
 0x2c6   :  { %v2842_v34 = vpop.eup %2841  ;;  %833 = vadd.xlane.f32.xlu1 %v832_v32  ;;  %830 = vadd.xlane.f32.xlu0 %v829_v47 }
 0x2c7   :  { %v817_v21 = vmul.f32 %v2842_v34, %v3293_v11 }
 0x2c8   :  { %2684 = vmatpush3.bf16.msra.mxu0 %v2681_v29 }
 0x2c9   :  { %2686 = vmatprep.subr.bf16.mxu0 %v2685_v35  ;;  %v835_v26 = vsel %vm334_vm2, %v817_v21, 0.0 }
 0x2ca   :  { %v2844_v37 = vpop.eup %2843  ;;  %839 = vadd.xlane.f32.xlu1 %v838_v23  ;;  %836 = vadd.xlane.f32.xlu0 %v835_v26 }
 0x2cb   :  { %v819_v1 = vmul.f32 %v2844_v37, %v3313_v38 }
 0x2cc   :  { %2688 = vmatpush3.bf16.msra.mxu0 %v2685_v35 }
 0x2cd   :  { %v841_v45 = vsel %vm334_vm2, %v819_v1, 0.0 }
 0x2ce   :  { %842 = vadd.xlane.f32.xlu0 %v841_v45 }
 0x2cf   :  { %2558 = vmatmul.mubr.msk.f32.vlgmr.msra.gmra.mrb[8].mxu0 %vm334_vm2, %v813_v33 }
 0x2d0   :  { %2560 = vmatprep.mubr.msk.f32.mxu0 %vm334_vm2, %v814_v61 }
 0x2d3   :  { %2561 = vmatmul.mubr.msk.f32.gmra.mrb[10].mxu0 %vm334_vm2, %v815_v53 }
 0x2d4   :  { %2563 = vmatprep.mubr.msk.f32.mxu0 %vm334_vm2, %v816_v44 }
 0x2d7   :  { %2564 = vmatmul.mubr.msk.f32.gmra.mrb[12].mxu0 %vm334_vm2, %v817_v21 }
 0x2d8   :  { %2566 = vmatprep.mubr.msk.f32.mxu0 %vm334_vm2, %v818_v52 }
 0x2db   :  { %2567 = vmatmul.mubr.msk.f32.gmra.mrb[14].mxu0 %vm334_vm2, %v819_v1 }
 0x336   :  { %v404_v41 = vpop.xlane.xlu1 %403 }
 0x337   :  { %v401_v49 = vpop.xlane.xlu0 %400  ;;  %v553_v56 = vadd.f32 9e-15, %v404_v41 }
 0x338   :  { %v552_v58 = vadd.f32 9e-15, %v401_v49 }
 0x339   :  { %2845 = vrcp.f32 %v553_v56 }
 0x33a   :  { %2847 = vrcp.f32 %v552_v58 }
 0x33b   :  { %v407_v43 = vpop.xlane.xlu0 %406 }
 0x33c   :  { %v554_v10 = vadd.f32 9e-15, %v407_v43 }
 0x33f   :  { %v410_v57 = vpop.xlane.xlu0 %409 }
 0x340   :  { %v555_v62 = vadd.f32 9e-15, %v410_v57 }
 0x342   :  { %2849 = vrcp.f32 %v555_v62 }
 0x343   :  { %v413_v0 = vpop.xlane.xlu1 %412  ;;  %2851 = vrcp.f32 %v554_v10  ;;  %v2846_v9 = vpop.eup %2845 }
 0x344   :  { %v2848_v54 = vpop.eup %2847  ;;  %v556_v8 = vadd.f32 9e-15, %v413_v0 }
 0x347   :  { %v416_v51 = vpop.xlane.xlu0 %415  ;;  %v419_v55 = vpop.xlane.xlu1 %418 }
 0x348   :  { %v557_v4 = vadd.f32 9e-15, %v416_v51  ;;  %v558_v27 = vadd.f32 9e-15, %v419_v55 }
 0x34a   :  { %2853 = vrcp.f32 %v557_v4 }
 0x34b   :  { %v422_v18 = vpop.xlane.xlu0 %421  ;;  %2855 = vrcp.f32 %v556_v8  ;;  %v822_v13 = vpop.xlane.xlu1 %821 }
 0x34c   :  { %v559_v14 = vadd.f32 9e-15, %v422_v18  ;;  %v2850_v30 = vpop.eup %2849 }
 0x34d   :  { %v2852_v42 = vpop.eup %2851 }
 0x34f   :  { %v825_v44 = vpop.xlane.xlu0 %824  ;;  %v828_v58 = vpop.xlane.xlu1 %827 }
 0x350   :  { %v998_v50 = vadd.f32 9e-15, %v825_v44 }
 0x353   :  { %v831_v49 = vpop.xlane.xlu0 %830  ;;  %v834_v55 = vpop.xlane.xlu1 %833 }
 0x354   :  { %v2854_v46 = vpop.eup %2853 }
 0x355   :  { %v2856_v29 = vpop.eup %2855 }
 0x37d   :  { %v2531_v3 = vpop.f32.mrb[0].mxu1 }
 0x37e   :  { %v569_v5 = vmul.f32 %v2846_v9, %v2531_v3  ;;  %v513_v6 = vpop.f32.mrb[1].mxu1 }
 0x37f   :  { %v568_v60 = vmul.f32 %v2848_v54, %v513_v6  ;;  %v997_v54 = vadd.f32 9e-15, %v822_v13 }
 0x380   :  { %v585_v2 = vmin.f32 %v569_v5, 0.0  ;;  %vm577_vm9 = vcmp.gt.f32.partialorder %v569_v5, 0.0 }
 0x381   :  { %v584_v25 = vmin.f32 %v568_v60, 0.0  ;;  %vm576_vm8 = vcmp.gt.f32.partialorder %v568_v60, 0.0 }
 0x382   :  { %v594_v61 = vmul.f32 1.442695, %v585_v2  ;;  %v1000_v2 = vadd.f32 9e-15, %v831_v49 }
 0x383   :  { %v592_v7 = vmul.f32 1.442695, %v584_v25  ;;  %v999_v25 = vadd.f32 9e-15, %v828_v58 }
 0x384   :  { %2857 = vpow2.f32 %v594_v61  ;;  %v2534_v31 = vpop.f32.mrb[2].mxu1 }
 0x385   :  { %2859 = vpow2.f32 %v592_v7  ;;  %v3463_v39 = vmul.f32 %v2850_v30, %v2534_v31  ;;  %v523_v33 = vpop.f32.mrb[3].mxu1  ;;  %v1001_v7 = vadd.f32 9e-15, %v834_v55 }
 0x386   :  { %2861 = vrcp.f32 %v559_v14  ;;  %v3465_v22 = vmul.f32 %v2852_v42, %v523_v33  ;;  %v840_v42 = vpop.xlane.xlu1 %839 }
 0x387   :  { %2863 = vrcp.f32 %v558_v27  ;;  %v587_v36 = vmin.f32 %v3463_v39, 0.0  ;;  %vm579_vm13 = vcmp.gt.f32.partialorder %v3463_v39, 0.0 }
 0x388   :  { %v586_v40 = vmin.f32 %v3465_v22, 0.0  ;;  %vm578_vm11 = vcmp.gt.f32.partialorder %v3465_v22, 0.0 }
 0x389   :  { %v598_v63 = vmul.f32 1.442695, %v587_v36 }
 0x38a   :  { %v596_v17 = vmul.f32 1.442695, %v586_v40 }
 0x38b   :  { %2865 = vpow2.f32 %v598_v63 }
 0x38c   :  { %2867 = vpow2.f32 %v596_v17  ;;  %v2537_v28 = vpop.f32.mrb[4].mxu1 }
 0x38d   :  { %v3469_v53 = vmul.f32 %v2854_v46, %v2537_v28  ;;  %v533_v32 = vpop.f32.mrb[5].mxu1 }
 0x38e   :  { %v2858_v47 = vpop.eup %2857  ;;  %v3471_v52 = vmul.f32 %v2856_v29, %v533_v32 }
 0x38f   :  { %v2860_v34 = vpop.eup %2859  ;;  %v2322_v35 = vadd.f32 -1.0, %v2858_v47  ;;  %v589_v21 = vmin.f32 %v3469_v53, 0.0  ;;  %vm581_vm0 = vcmp.gt.f32.partialorder %v3469_v53, 0.0 }
 0x390   :  { %v2862_v23 = vpop.eup %2861  ;;  %v588_v26 = vmin.f32 %v3471_v52, 0.0  ;;  %v2540_v37 = vpop.f32.mrb[6].mxu1  ;;  %v2321_v1 = vadd.f32 -1.0, %v2860_v34  ;;  %vm580_vm14 = vcmp.gt.f32.partialorder %v3471_v52, 0.0 }
 0x391   :  { %v2864_v45 = vpop.eup %2863  ;;  %v602_v41 = vmul.f32 1.442695, %v589_v21  ;;  %v3475_v43 = vmul.f32 %v2862_v23, %v2540_v37  ;;  %v543_v56 = vpop.f32.mrb[7].mxu1  ;;  %v617_v51 = vsel %vm577_vm9, %v569_v5, %v2322_v35 }
 0x392   :  { %v600_v57 = vmul.f32 1.442695, %v588_v26  ;;  %v3477_v62 = vmul.f32 %v2864_v45, %v543_v56  ;;  %v616_v10 = vsel %vm576_vm8, %v568_v60, %v2321_v1  ;;  %v837_v5 = vpop.xlane.xlu0 %836 }
 0x393   :  { %2869 = vpow2.f32 %v602_v41  ;;  %v591_v0 = vmin.f32 %v3475_v43, 0.0  ;;  %2571 = vmatprep.mubr.msk.f32.mxu1 %vm1072_vm6, %v616_v10  ;;  %v1002_v61 = vadd.f32 9e-15, %v837_v5  ;;  %vm583_vm9 = vcmp.gt.f32.partialorder %v3475_v43, 0.0 }
 0x394   :  { %2871 = vpow2.f32 %v600_v57  ;;  %v590_v9 = vmin.f32 %v3477_v62, 0.0  ;;  %2572 = vmatmul.mubr.msk.f32.vlgmr.msra.gmra.mrb[8].mxu1 %vm1072_vm6, %v617_v51  ;;  %vm582_vm8 = vcmp.gt.f32.partialorder %v3477_v62, 0.0 }
 0x395   :  { %v2866_v3 = vpop.eup %2865  ;;  %v606_v4 = vmul.f32 1.442695, %v591_v0  ;;  %2584 = vmatpush3.msra.mxu1 %v3460_v48  ;;  %2873 = vrcp.f32 %v998_v50 }
 0x396   :  { %v2868_v6 = vpop.eup %2867  ;;  %v604_v8 = vmul.f32 1.442695, %v590_v9  ;;  %v2324_v18 = vadd.f32 -1.0, %v2866_v3  ;;  %v843_v30 = vpop.xlane.xlu0 %842 }
 0x397   :  { %2875 = vpow2.f32 %v606_v4  ;;  %v2323_v60 = vadd.f32 -1.0, %v2868_v6  ;;  %v1004_v63 = vadd.f32 9e-15, %v843_v30 }
 0x398   :  { %2877 = vpow2.f32 %v604_v8  ;;  %v619_v48 = vsel %vm579_vm13, %v3463_v39, %v2324_v18  ;;  %v1003_v39 = vadd.f32 9e-15, %v840_v42 }
 0x399   :  { %2879 = vrcp.f32 %v997_v54  ;;  %v618_v14 = vsel %vm578_vm11, %v3465_v22, %v2323_v60 }
 0x39a   :  { %2574 = vmatprep.mubr.msk.f32.mxu1 %vm1072_vm6, %v618_v14  ;;  %2881 = vrcp.f32 %v1000_v2 }
 0x39b   :  { %2575 = vmatmul.mubr.msk.f32.gmra.mrb[10].mxu1 %vm1072_vm6, %v619_v48  ;;  %2883 = vrcp.f32 %v999_v25 }
 0x39c   :  { %2885 = vrcp.f32 %v1002_v61 }
 0x39d   :  { %v2870_v27 = vpop.eup %2869  ;;  %2887 = vrcp.f32 %v1001_v7 }
 0x39e   :  { %v2872_v31 = vpop.eup %2871  ;;  %v2326_v33 = vadd.f32 -1.0, %v2870_v27  ;;  %2889 = vrcp.f32 %v1004_v63 }
 0x39f   :  { %v2325_v36 = vadd.f32 -1.0, %v2872_v31  ;;  %v2874_v40 = vpop.eup %2873  ;;  %2891 = vrcp.f32 %v1003_v39 }
 0x3a0   :  { %v621_v13 = vsel %vm581_vm0, %v3469_v53, %v2326_v33 }
 0x3a1   :  { %v2876_v22 = vpop.eup %2875  ;;  %v620_v17 = vsel %vm580_vm14, %v3471_v52, %v2325_v36 }
 0x3a2   :  { %v2878_v44 = vpop.eup %2877  ;;  %v2559_v46 = vpop.f32.mrb[8].mxu0  ;;  %2577 = vmatprep.mubr.msk.f32.mxu1 %vm1072_vm6, %v620_v17  ;;  %v2328_v28 = vadd.f32 -1.0, %v2876_v22 }
 0x3a3   :  { %v2880_v29 = vpop.eup %2879  ;;  %v3495_v32 = vmul.f32 %v2874_v40, %v2559_v46  ;;  %v958_v47 = vpop.f32.mrb[9].mxu0  ;;  %2578 = vmatmul.mubr.msk.f32.gmra.mrb[12].mxu1 %vm1072_vm6, %v621_v13  ;;  %v2327_v34 = vadd.f32 -1.0, %v2878_v44 }
 0x3a4   :  { %v1013_v35 = vmul.f32 %v2880_v29, %v958_v47  ;;  %v2882_v53 = vpop.eup %2881  ;;  %v623_v37 = vsel %vm583_vm9, %v3475_v43, %v2328_v28 }
 0x3a5   :  { %v1030_v52 = vmin.f32 %v3495_v32, 0.0  ;;  %v622_v21 = vsel %vm582_vm8, %v3477_v62, %v2327_v34  ;;  %v2884_v1 = vpop.eup %2883  ;;  %vm1022_vm13 = vcmp.gt.f32.partialorder %v3495_v32, 0.0 }
 0x3a6   :  { %v1029_v23 = vmin.f32 %v1013_v35, 0.0  ;;  %v2562_v26 = vpop.f32.mrb[10].mxu0  ;;  %2580 = vmatprep.mubr.msk.f32.mxu1 %vm1072_vm6, %v622_v21  ;;  %v2886_v57 = vpop.eup %2885  ;;  %vm1021_vm11 = vcmp.gt.f32.partialorder %v1013_v35, 0.0 }
 0x3a7   :  { %v1039_v45 = vmul.f32 1.442695, %v1030_v52  ;;  %v1016_v50 = vmul.f32 %v2882_v53, %v2562_v26  ;;  %v968_v49 = vpop.f32.mrb[11].mxu0  ;;  %2581 = vmatmul.mubr.msk.f32.gmra.mrb[14].mxu1 %vm1072_vm6, %v623_v37  ;;  %v2888_v51 = vpop.eup %2887  ;;  %v3026_v37 = vmov 9  }
 0x3a8   :  { %v1037_v41 = vmul.f32 1.442695, %v1029_v23  ;;  %v1015_v56 = vmul.f32 %v2884_v1, %v968_v49  ;;  %v2890_v6 = vpop.eup %2889  ;;  %2781 = vset.pattern.permute.xlu0 %v3026_v37  ;;  %v3027_v1 = vmov 8  }
 0x3a9   :  { %2893 = vpow2.f32 %v1039_v45  ;;  %v1032_v58 = vmin.f32 %v1016_v50, 0.0  ;;  %v2892_v5 = vpop.eup %2891  ;;  %vm1024_vm0 = vcmp.gt.f32.partialorder %v1016_v50, 0.0  ;;  %2780 = vset.pattern.permute.xlu1 %v3027_v1  ;;  %v2353_v45 = vld [vmem:[%s3924_s5] ss:$0 sm:$0xff]  ;;  %s3030_s5 = smov 124  }
 0x3aa   :  { %2895 = vpow2.f32 %v1037_v41  ;;  %v1031_v62 = vmin.f32 %v1015_v56, 0.0  ;;  %v2565_v10 = vpop.f32.mrb[12].mxu0  ;;  %vm1023_vm14 = vcmp.gt.f32.partialorder %v1015_v56, 0.0 }
 0x3ab   :  { %v1043_v0 = vmul.f32 1.442695, %v1032_v58  ;;  %v1018_v9 = vmul.f32 %v2886_v57, %v2565_v10  ;;  %v978_v3 = vpop.f32.mrb[13].mxu0 }
 0x3ac   :  { %v1041_v54 = vmul.f32 1.442695, %v1031_v62  ;;  %v1017_v43 = vmul.f32 %v2888_v51, %v978_v3 }
 0x3ad   :  { %2897 = vpow2.f32 %v1043_v0  ;;  %v1034_v4 = vmin.f32 %v1018_v9, 0.0  ;;  %vm1026_vm9 = vcmp.gt.f32.partialorder %v1018_v9, 0.0 }
 0x3ae   :  { %2899 = vpow2.f32 %v1041_v54  ;;  %v1033_v8 = vmin.f32 %v1017_v43, 0.0  ;;  %v2568_v18 = vpop.f32.mrb[14].mxu0  ;;  %vm1025_vm8 = vcmp.gt.f32.partialorder %v1017_v43, 0.0 }
 0x3af   :  { %v1047_v60 = vmul.f32 1.442695, %v1034_v4  ;;  %v1020_v55 = vmul.f32 %v2890_v6, %v2568_v18  ;;  %v988_v2 = vpop.f32.mrb[15].mxu0 }
 0x3b0   :  { %v1045_v25 = vmul.f32 1.442695, %v1033_v8  ;;  %v1019_v14 = vmul.f32 %v2892_v5, %v988_v2 }
 0x3b1   :  { %2901 = vpow2.f32 %v1047_v60  ;;  %v1036_v48 = vmin.f32 %v1020_v55, 0.0 }
 0x3b2   :  { %2903 = vpow2.f32 %v1045_v25  ;;  %v1035_v61 = vmin.f32 %v1019_v14, 0.0 }
 0x3b3   :  { %v2894_v27 = vpop.eup %2893  ;;  %v1051_v7 = vmul.f32 1.442695, %v1036_v48 }
 0x3b4   :  { %v2896_v30 = vpop.eup %2895  ;;  %v2338_v31 = vadd.f32 -1.0, %v2894_v27  ;;  %v1049_v42 = vmul.f32 1.442695, %v1035_v61 }
 0x3b5   :  { %2905 = vpow2.f32 %v1051_v7  ;;  %v2337_v33 = vadd.f32 -1.0, %v2896_v30 }
 0x3b6   :  { %2907 = vpow2.f32 %v1049_v42  ;;  %v1062_v22 = vsel %vm1022_vm13, %v3495_v32, %v2338_v31  ;;  %vm1028_vm13 = vcmp.gt.f32.partialorder %v1020_v55, 0.0 }
 0x3b7   :  { %v2898_v36 = vpop.eup %2897  ;;  %v1061_v40 = vsel %vm1021_vm11, %v1013_v35, %v2337_v33  ;;  %vm1027_vm11 = vcmp.gt.f32.partialorder %v1019_v14, 0.0 }
 0x3b8   :  { %v2900_v63 = vpop.eup %2899  ;;  %2585 = vmatprep.mubr.msk.f32.mxu1 %vm1072_vm6, %v1061_v40  ;;  %v2340_v39 = vadd.f32 -1.0, %v2898_v36 }
 0x3b9   :  { %2586 = vmatmul.mubr.msk.f32.vlgmr.msra.gmra.mrb[8].mxu1 %vm1072_vm6, %v1062_v22  ;;  %v2339_v17 = vadd.f32 -1.0, %v2900_v63 }
 0x3ba   :  { %v1064_v28 = vsel %vm1024_vm0, %v1016_v50, %v2340_v39 }
 0x3bb   :  { %v2902_v44 = vpop.eup %2901  ;;  %v1063_v46 = vsel %vm1023_vm14, %v1015_v56, %v2339_v17 }
 0x3bc   :  { %v2904_v13 = vpop.eup %2903  ;;  %2588 = vmatprep.mubr.msk.f32.mxu1 %vm1072_vm6, %v1063_v46  ;;  %v2342_v29 = vadd.f32 -1.0, %v2902_v44 }
 0x3bd   :  { %2589 = vmatmul.mubr.msk.f32.gmra.mrb[10].mxu1 %vm1072_vm6, %v1064_v28  ;;  %v2341_v47 = vadd.f32 -1.0, %v2904_v13 }
 0x3be   :  { %v1066_v52 = vsel %vm1026_vm9, %v1018_v9, %v2342_v29 }
 0x3bf   :  { %v2906_v32 = vpop.eup %2905  ;;  %v1065_v34 = vsel %vm1025_vm8, %v1017_v43, %v2341_v47 }
 0x3c0   :  { %v2908_v35 = vpop.eup %2907  ;;  %2591 = vmatprep.mubr.msk.f32.mxu1 %vm1072_vm6, %v1065_v34  ;;  %v2344_v21 = vadd.f32 -1.0, %v2906_v32 }
 0x3c1   :  { %2592 = vmatmul.mubr.msk.f32.gmra.mrb[12].mxu1 %vm1072_vm6, %v1066_v52  ;;  %v2343_v53 = vadd.f32 -1.0, %v2908_v35 }
 0x3c2   :  { %v1068_v26 = vsel %vm1028_vm13, %v1020_v55, %v2344_v21 }
 0x3c3   :  { %v1067_v23 = vsel %vm1027_vm11, %v1019_v14, %v2343_v53 }
 0x3c4   :  { %2594 = vmatprep.mubr.msk.f32.mxu1 %vm1072_vm6, %v1067_v23 }
 0x3c5   :  { %2595 = vmatmul.mubr.msk.f32.gmra.mrb[14].mxu1 %vm1072_vm6, %v1068_v26 }
 0x48c   :  { %v2587_v50 = vpop.f32.mrb[8].mxu1 }
 0x48d   :  { %v2721_v49 = vadd.f32 %v2587_v50, %v2353_v45  ;;  %v1306_v41 = vpop.f32.mrb[9].mxu1 }
 0x48e   :  { %v2722_v56 = vadd.f32 %v2353_v45, %v1306_v41 }
 0x48f   :  { %1736 = vrot.lane.b32.xlu1 %v2721_v49, %s3028_s2  ;;  %1363 = vrot.lane.b32.xlu0 %v2721_v49, %s3029_s7 }
 0x490   :  { %v2590_v58 = vpop.f32.mrb[10].mxu1  ;;  %v2689_v57 = vpack.c.bf16 %v2721_v49, %v2722_v56  ;;  %v2784_v62 = vpack.i.bf16 %v2721_v49, %v2722_v56 }
 0x491   :  { %v3522_v10 = vadd.f32 %v2590_v58, %v2353_v45  ;;  %v1316_v51 = vpop.f32.mrb[11].mxu1 }
 0x492   :  { %v3524_v0 = vadd.f32 %v2353_v45, %v1316_v51  ;;  %2690 = vmatprep.subr.bf16.mxu0 %v2689_v57 }
 0x493   :  { %1422 = vperm.xlu1 %2780, %v2721_v49   ;;  %1795 = vperm.xlu0 %2781, %v2721_v49  }
 0x494   :  { %2692 = vmatpush3.bf16.msra.mxu0 %v2689_v57  ;;  %v2593_v9 = vpop.f32.mrb[12].mxu1  ;;  %v2693_v3 = vpack.c.bf16 %v3522_v10, %v3524_v0  ;;  %v2797_v54 = vpack.i.bf16 %v3522_v10, %v3524_v0 }
 0x495   :  { %v3530_v43 = vadd.f32 %v2593_v9, %v2353_v45  ;;  %v1326_v4 = vpop.f32.mrb[13].mxu1 }
 0x496   :  { %v3532_v6 = vadd.f32 %v2353_v45, %v1326_v4  ;;  %2694 = vmatprep.subr.bf16.mxu0 %v2693_v3 }
 0x497   :  { %1734 = vrot.lane.b32.xlu0 %v2722_v56, %s3028_s2  ;;  %1361 = vrot.lane.b32.xlu1 %v2722_v56, %s3029_s7 }
 0x498   :  { %2696 = vmatpush3.bf16.msra.mxu0 %v2693_v3  ;;  %v2596_v8 = vpop.f32.mrb[14].mxu1  ;;  %2783 = vset.pattern.permute.xlu1 %v3026_v37  ;;  %v2697_v18 = vpack.c.bf16 %v3530_v43, %v3532_v6  ;;  %v2802_v5 = vpack.i.bf16 %v3530_v43, %v3532_v6 }
 0x499   :  { %v3541_v60 = vadd.f32 %v2596_v8, %v2353_v45  ;;  %v1336_v55 = vpop.f32.mrb[15].mxu1  ;;  %2782 = vset.pattern.permute.xlu0 %v3027_v1 }
 0x49a   :  { %v3544_v2 = vadd.f32 %v2353_v45, %v1336_v55  ;;  %2698 = vmatprep.subr.bf16.mxu0 %v2697_v18 }
 0x49b   :  { %1418 = vperm.xlu0 %2782, %v2722_v56   ;;  %1791 = vperm.xlu1 %2783, %v2722_v56  }
 0x49c   :  { %2700 = vmatpush3.bf16.msra.mxu0 %v2697_v18  ;;  %v2701_v25 = vpack.c.bf16 %v3541_v60, %v3544_v2 }
 0x49e   :  { %2702 = vmatprep.subr.bf16.mxu0 %v2701_v25 }
 0x49f   :  { %2785 = vrot.lane.b32.xlu1 %v2784_v62, %s3030_s5  ;;  %1430 = vperm.xlu0 %2782, %v3522_v10  }
 0x4a0   :  { %2704 = vmatpush3.bf16.msra.mxu0 %v2701_v25 }
 0x4a3   :  { %1367 = vrot.lane.b32.xlu1 %v3522_v10, %s3029_s7  ;;  %1738 = vrot.lane.b32.xlu0 %v3524_v0, %s3028_s2 }
 0x4a7   :  { %1740 = vrot.lane.b32.xlu1 %v3522_v10, %s3028_s2  ;;  %1438 = vperm.xlu0 %2782, %v3530_v43  }
 0x4ab   :  { %1803 = vperm.xlu1 %2783, %v3522_v10   ;;  %1369 = vrot.lane.b32.xlu0 %v3532_v6, %s3029_s7 }
 0x4ac   :  { %2792 = vset.pattern.permute.xlu0 %v3026_v37 }
 0x4af   :  { %1365 = vrot.lane.b32.xlu1 %v3524_v0, %s3029_s7  ;;  %1742 = vrot.lane.b32.xlu0 %v3532_v6, %s3028_s2 }
 0x4b0   :  { %2789 = vset.pattern.permute.xlu1 %v3027_v1 }
 0x4b3   :  { %1426 = vperm.xlu1 %2789, %v3524_v0   ;;  %1807 = vperm.xlu0 %2792, %v3532_v6  }
 0x4b7   :  { %2790 = vset.pattern.permute.xlu1 %v3026_v37  ;;  %2793 = vset.pattern.permute.xlu0 %v3027_v1 }
 0x4b8   :  { %1799 = vperm.xlu1 %2790, %v3524_v0   ;;  %1446 = vperm.xlu0 %2793, %v3541_v60  }
 0x4bc   :  { %1371 = vrot.lane.b32.xlu1 %v3530_v43, %s3029_s7  ;;  %1373 = vrot.lane.b32.xlu0 %v3544_v2, %s3029_s7 }
 0x4c0   :  { %1744 = vrot.lane.b32.xlu1 %v3530_v43, %s3028_s2  ;;  %1746 = vrot.lane.b32.xlu0 %v3544_v2, %s3028_s2 }
 0x4c4   :  { %1811 = vperm.xlu1 %2790, %v3530_v43  }
 0x4c8   :  { %2791 = vset.pattern.permute.xlu1 %v3027_v1 }
 0x4c9   :  { %1434 = vperm.xlu1 %2791, %v3532_v6  }
 0x4cd   :  { %1375 = vrot.lane.b32.xlu1 %v3541_v60, %s3029_s7 }
 0x4ce   :  { %2794 = vset.pattern.permute.xlu1 %v3026_v37 }
 0x4d1   :  { %1748 = vrot.lane.b32.xlu1 %v3541_v60, %s3028_s2 }
 0x4d5   :  { %1819 = vperm.xlu1 %2794, %v3541_v60  }
 0x4d9   :  { %2795 = vset.pattern.permute.xlu1 %v3027_v1 }
 0x4da   :  { %1442 = vperm.xlu1 %2795, %v3544_v2  }
 0x4de   :  { %2796 = vset.pattern.permute.xlu1 %v3026_v37 }
 0x4df   :  { %1815 = vperm.xlu1 %2796, %v3544_v2  }
 0x501   :  { %v1737_v14 = vpop.permute.xlu1 %1736  ;;  %v1364_v48 = vpop.permute.xlu0 %1363 }
 0x512   :  { %v1423_v61 = vpop.permute.xlu1 %1422  ;;  %v3593_v27 = vpop.permute.xlu0 %1795 }
 0x516   :  { %v1735_v7 = vpop.permute.xlu0 %1734  ;;  %v1362_v30 = vpop.permute.xlu1 %1361 }
 0x517   :  { %1758 = vxpose.xlu1.b32.start [1/8] (short) (narrow) %v1735_v7, 8  ;;  %1385 = vxpose.xlu0.b32.start [1/8] (short) (narrow) %v1362_v30, 8 }
 0x51a   :  { %v1419_v31 = vpop.permute.xlu0 %1418  ;;  %v3595_v42 = vpop.permute.xlu1 %1791 }
 0x51b   :  { %1759 = vxpose.xlu1.b32.cont [2/8] (short) (narrow) %v1737_v14, 8  ;;  %1386 = vxpose.xlu0.b32.cont [2/8] (short) (narrow) %v1364_v48, 8 }
 0x51e   :  { %v2786_v33 = vpop.permute.xlu1 %2785  ;;  %v1431_v36 = vpop.permute.xlu0 %1430 }
 0x51f   :  { %v2788_v40 = vunpack.i.h.bf16 %v2786_v33  ;;  %v2787_v63 = vunpack.i.l.bf16 %v2786_v33 }
 0x521   :  { %v3597_v22 = vpack.c.bf16 %v2788_v40, %v2787_v63 }
 0x522   :  { %v1368_v39 = vpop.permute.xlu1 %1367  ;;  %v1739_v17 = vpop.permute.xlu0 %1738 }
 0x523   :  { %1760 = vxpose.xlu1.b32.cont [3/8] (short) (narrow) %v1739_v17, 8  ;;  %2706 = vmatprep.subr.bf16.mxu0 %v3597_v22 }
 0x526   :  { %v1741_v44 = vpop.permute.xlu1 %1740  ;;  %v3600_v46 = vpop.permute.xlu0 %1438 }
 0x527   :  { %1761 = vxpose.xlu1.b32.cont [4/8] (short) (narrow) %v1741_v44, 8 }
 0x52a   :  { %v3602_v13 = vpop.permute.xlu1 %1803  ;;  %v1370_v28 = vpop.permute.xlu0 %1369 }
 0x52e   :  { %v1366_v29 = vpop.permute.xlu1 %1365  ;;  %v1743_v47 = vpop.permute.xlu0 %1742 }
 0x52f   :  { %1762 = vxpose.xlu1.b32.cont [5/8] (short) (narrow) %v1743_v47, 8  ;;  %1387 = vxpose.xlu0.b32.cont [3/8] (short) (narrow) %v1366_v29, 8 }
 0x532   :  { %v1427_v32 = vpop.permute.xlu1 %1426  ;;  %v3604_v34 = vpop.permute.xlu0 %1807 }
 0x533   :  { %1388 = vxpose.xlu0.b32.cont [4/8] (short) (narrow) %v1368_v39, 8 }
 0x537   :  { %v1800_v35 = vpop.permute.xlu1 %1799  ;;  %v3606_v52 = vpop.permute.xlu0 %1446  ;;  %1389 = vxpose.xlu0.b32.cont [5/8] (short) (narrow) %v1370_v28, 8 }
 0x53b   :  { %v1372_v21 = vpop.permute.xlu1 %1371  ;;  %v1374_v53 = vpop.permute.xlu0 %1373 }
 0x53c   :  { %1390 = vxpose.xlu0.b32.cont [6/8] (short) (narrow) %v1372_v21, 8 }
 0x53f   :  { %v1745_v23 = vpop.permute.xlu1 %1744  ;;  %v1747_v26 = vpop.permute.xlu0 %1746 }
 0x540   :  { %1763 = vxpose.xlu1.b32.cont [6/8] (short) (narrow) %v1745_v23, 8  ;;  %1391 = vxpose.xlu0.b32.cont [7/8] (short) (narrow) %v1374_v53, 8 }
 0x543   :  { %v3608_v1 = vpop.permute.xlu1 %1811 }
 0x544   :  { %1764 = vxpose.xlu1.b32.cont [7/8] (short) (narrow) %v1747_v26, 8 }
 0x548   :  { %v1435_v45 = vpop.permute.xlu1 %1434 }
 0x54c   :  { %v1376_v50 = vpop.permute.xlu1 %1375 }
 0x54d   :  { %1392 = vxpose.xlu0.b32.end [8/8] (short) (narrow) %v1376_v50, 8 }
 0x550   :  { %v1749_v49 = vpop.permute.xlu1 %1748 }
 0x551   :  { %1765 = vxpose.xlu1.b32.end [8/8] (short) (narrow) %v1749_v49, 8 }
 0x554   :  { %v3611_v41 = vpop.permute.xlu1 %1819 }
 0x559   :  { %v1443_v56 = vpop.permute.xlu1 %1442 }
 0x55e   :  { %v1816_v58 = vpop.permute.xlu1 %1815 }
 0x576   :  { %2812 = vset.pattern.permute.xlu0 %v3026_v37 }
 0x5b1   :  { %v1401_v57 = vpop.trf.xlu0 }
 0x5b2   :  { %v1452_v62 = vrot.slane %v1401_v57, %v3207_v12 }
 0x5b4   :  { %v1454_v51 = vadd.f32 %v1452_v62, %v1423_v61  ;;  %v1453_v9 = vadd.f32 %v1452_v62, %v1419_v31  ;;  %v1459_v3 = vadd.f32 %v1452_v62, %v1443_v56  ;;  %v1455_v4 = vadd.f32 %v1452_v62, %v1427_v32 }
 0x5b5   :  { %v1774_v8 = vpop.trf.xlu1  ;;  %v1456_v18 = vadd.f32 %v1452_v62, %v1431_v36  ;;  %v1457_v55 = vadd.f32 %v1452_v62, %v1435_v45  ;;  %v1458_v47 = vadd.f32 %v1452_v62, %v3600_v46 }
 0x5b6   :  { %v3615_v25 = vrot.slane %v1774_v8, %v3207_v12  ;;  %vm1462_vm6 = vcmp.gt.f32.partialorder %v1454_v51, 0.0  ;;  %v1470_v14 = vmul.f32 0.2, %v1454_v51  ;;  %vm1461_vm14 = vcmp.gt.f32.partialorder %v1453_v9, 0.0 }
 0x5b7   :  { %v1469_v37 = vmul.f32 0.2, %v1453_v9  ;;  %vm1467_vm0 = vcmp.gt.f32.partialorder %v1459_v3, 0.0  ;;  %v1475_v48 = vmul.f32 0.2, %v1459_v3  ;;  %vm1463_vm8 = vcmp.gt.f32.partialorder %v1455_v4, 0.0 }
 0x5b8   :  { %v3617_v7 = vsel %vm1462_vm6, %v1454_v51, %v1470_v14  ;;  %v1471_v30 = vmul.f32 0.2, %v1455_v4  ;;  %v1826_v61 = vadd.f32 %v3615_v25, %v3595_v42  ;;  %vm1464_vm9 = vcmp.gt.f32.partialorder %v1456_v18, 0.0 }
 0x5b9   :  { %v1486_v31 = vsel %vm319_vm1, %v3617_v7, -1e+30  ;;  %v3624_v12 = vsel %vm1461_vm14, %v1453_v9, %v1469_v37  ;;  %v3626_v33 = vsel %vm1467_vm0, %v1459_v3, %v1475_v48  ;;  %v1472_v36 = vmul.f32 0.2, %v1456_v18 }
 0x5ba   :  { %v1496_v40 = vsel %vm334_vm2, %v1486_v31, -inf  ;;  %v1485_v63 = vsel %vm318_vm3, %v3624_v12, -1e+30  ;;  %v1491_v42 = vsel %vm324_vm4, %v3626_v33, -1e+30  ;;  %v3635_v39 = vsel %vm1463_vm8, %v1455_v4, %v1471_v30 }
 0x5bb   :  { %1497 = vmax.xlane.f32.xlu1 %v1496_v40  ;;  %v1493_v17 = vsel %vm334_vm2, %v1485_v63, -inf  ;;  %vm1834_vm11 = vcmp.gt.f32.partialorder %v1826_v61, 0.0  ;;  %v1487_v44 = vsel %vm320_vm5, %v3635_v39, -1e+30  ;;  %v1842_v28 = vmul.f32 0.2, %v1826_v61 }
 0x5bc   :  { %1494 = vmax.xlane.f32.xlu0 %v1493_v17  ;;  %v1828_v29 = vadd.f32 %v3615_v25, %v1800_v35  ;;  %v1511_v32 = vsel %vm334_vm2, %v1491_v42, -inf  ;;  %v3645_v21 = vsel %vm1464_vm9, %v1456_v18, %v1472_v36  ;;  %v1473_v53 = vmul.f32 0.2, %v1457_v55 }
 0x5bd   :  { %v1830_v23 = vadd.f32 %v3615_v25, %v3604_v34  ;;  %v3649_v26 = vsel %vm1834_vm11, %v1826_v61, %v1842_v28  ;;  %vm1465_vm6 = vcmp.gt.f32.partialorder %v1457_v55, 0.0  ;;  %v1499_v50 = vsel %vm334_vm2, %v1487_v44, -inf }
 0x5be   :  { %vm1836_vm13 = vcmp.gt.f32.partialorder %v1828_v29, 0.0  ;;  %v1844_v45 = vmul.f32 0.2, %v1828_v29  ;;  %v1858_v46 = vsel %vm318_vm3, %v3649_v26, -1e+30  ;;  %v3660_v56 = vsel %vm1465_vm6, %v1457_v55, %v1473_v53 }
 0x5bf   :  { %1512 = vmax.xlane.f32.xlu1 %v1511_v32  ;;  %v1488_v35 = vsel %vm321_vm12, %v3645_v21, -1e+30  ;;  %v1846_v34 = vmul.f32 0.2, %v1830_v23  ;;  %vm1838_vm14 = vcmp.gt.f32.partialorder %v1830_v23, 0.0  ;;  %v1460_v51 = vadd.f32 %v1452_v62, %v3606_v52 }
 0x5c0   :  { %1500 = vmax.xlane.f32.xlu0 %v1499_v50  ;;  %v3658_v49 = vsel %vm1836_vm13, %v1828_v29, %v1844_v45  ;;  %v1474_v57 = vmul.f32 0.2, %v1458_v47  ;;  %v1866_v9 = vsel %vm334_vm2, %v1858_v46, -inf  ;;  %vm1466_vm0 = vcmp.gt.f32.partialorder %v1458_v47, 0.0 }
 0x5c1   :  { %v1832_v3 = vadd.f32 %v3615_v25, %v1816_v58  ;;  %v1502_v4 = vsel %vm334_vm2, %v1488_v35, -inf  ;;  %v1860_v8 = vsel %vm320_vm5, %v3658_v49, -1e+30  ;;  %v1489_v18 = vsel %vm322_vm15, %v3660_v56, -1e+30 }
 0x5c2   :  { %v3672_v55 = vsel %vm1838_vm14, %v1830_v23, %v1846_v34  ;;  %v3674_v62 = vsel %vm1466_vm0, %v1458_v47, %v1474_v57  ;;  %v1476_v14 = vmul.f32 0.2, %v1460_v51  ;;  %v1827_v58 = vadd.f32 %v3615_v25, %v3593_v27 }
 0x5c3   :  { %1867 = vmax.xlane.f32.xlu1 %v1866_v9  ;;  %v1848_v52 = vmul.f32 0.2, %v1832_v3  ;;  %vm1840_vm3 = vcmp.gt.f32.partialorder %v1832_v3, 0.0  ;;  %v1872_v37 = vsel %vm334_vm2, %v1860_v8, -inf  ;;  %vm1468_vm8 = vcmp.gt.f32.partialorder %v1460_v51, 0.0 }
 0x5c4   :  { %1503 = vmax.xlane.f32.xlu0 %v1502_v4  ;;  %v1505_v48 = vsel %vm334_vm2, %v1489_v18, -inf  ;;  %v1862_v30 = vsel %vm322_vm15, %v3672_v55, -1e+30  ;;  %v1490_v61 = vsel %vm323_vm7, %v3674_v62, -1e+30  ;;  %v3688_v36 = vsel %vm1468_vm8, %v1460_v51, %v1476_v14 }
 0x5c5   :  { %v3686_v31 = vsel %vm1840_vm3, %v1832_v3, %v1848_v52  ;;  %v1843_v27 = vmul.f32 0.2, %v1827_v58  ;;  %v1829_v40 = vadd.f32 %v3615_v25, %v3602_v13  ;;  %v1878_v63 = vsel %vm334_vm2, %v1862_v30, -inf }
 0x5c6   :  { %vm1835_vm5 = vcmp.gt.f32.partialorder %v1827_v58, 0.0  ;;  %v1508_v42 = vsel %vm334_vm2, %v1490_v61, -inf  ;;  %v1864_v17 = vsel %vm324_vm4, %v3686_v31, -1e+30  ;;  %v1492_v44 = vsel %vm325_vm10, %v3688_v36, -1e+30 }
 0x5c7   :  { %1873 = vmax.xlane.f32.xlu1 %v1872_v37  ;;  %v3700_v28 = vsel %vm1835_vm5, %v1827_v58, %v1843_v27  ;;  %v1845_v29 = vmul.f32 0.2, %v1829_v40  ;;  %v1831_v13 = vadd.f32 %v3615_v25, %v3608_v1  ;;  %v1884_v47 = vsel %vm334_vm2, %v1864_v17, -inf }
 0x5c8   :  { %1506 = vmax.xlane.f32.xlu0 %v1505_v48  ;;  %vm1837_vm15 = vcmp.gt.f32.partialorder %v1829_v40, 0.0  ;;  %v1514_v32 = vsel %vm334_vm2, %v1492_v44, -inf  ;;  %v1859_v53 = vsel %vm319_vm1, %v3700_v28, -1e+30  ;;  %v1833_v50 = vadd.f32 %v3615_v25, %v3611_v41 }
 0x5c9   :  { %v3709_v23 = vsel %vm1837_vm15, %v1829_v40, %v1845_v29  ;;  %v1847_v45 = vmul.f32 0.2, %v1831_v13  ;;  %vm1839_vm4 = vcmp.gt.f32.partialorder %v1831_v13, 0.0  ;;  %v1869_v1 = vsel %vm334_vm2, %v1859_v53, -inf }
 0x5ca   :  { %v1861_v46 = vsel %vm321_vm12, %v3709_v23, -1e+30  ;;  %v1849_v34 = vmul.f32 0.2, %v1833_v50  ;;  %vm1841_vm9 = vcmp.gt.f32.partialorder %v1833_v50, 0.0  ;;  %v2807_v4 = vpack.i.bf16 %v3541_v60, %v3544_v2 }
 0x5cb   :  { %1879 = vmax.xlane.f32.xlu1 %v1878_v63  ;;  %v3717_v35 = vsel %vm1839_vm4, %v1831_v13, %v1847_v45  ;;  %v1875_v57 = vsel %vm334_vm2, %v1861_v46, -inf  ;;  %vm2195_vm1 = vcmask 31744  }
 0x5cc   :  { %1509 = vmax.xlane.f32.xlu0 %v1508_v42  ;;  %v1863_v51 = vsel %vm323_vm7, %v3717_v35, -1e+30  ;;  %v3723_v41 = vsel %vm1841_vm9, %v1833_v50, %v1849_v34 }
 0x5cd   :  { %v1881_v25 = vsel %vm334_vm2, %v1863_v51, -inf  ;;  %v1865_v9 = vsel %vm325_vm10, %v3723_v41, -1e+30 }
 0x5ce   :  { %v1887_v3 = vsel %vm334_vm2, %v1865_v9, -inf }
 0x5cf   :  { %1885 = vmax.xlane.f32.xlu1 %v1884_v47 }
 0x5d0   :  { %1515 = vmax.xlane.f32.xlu0 %v1514_v32 }
 0x5d4   :  { %1870 = vmax.xlane.f32.xlu0 %v1869_v1 }
 0x5d8   :  { %1876 = vmax.xlane.f32.xlu0 %v1875_v57 }
 0x5dc   :  { %1882 = vmax.xlane.f32.xlu0 %v1881_v25 }
 0x5e0   :  { %1888 = vmax.xlane.f32.xlu0 %v1887_v3  ;;  %2803 = vrot.lane.b32.xlu1 %v2802_v5, %s3030_s5 }
 0x5e4   :  { %2808 = vrot.lane.b32.xlu1 %v2807_v4, %s3030_s5 }
 0x5f6   :  { %2798 = vrot.lane.b32.xlu0 %v2797_v54, %s3030_s5 }
 0x648   :  { %v1498_v8 = vpop.xlane.xlu1 %1497 }
 0x649   :  { %v1518_v18 = vsub.f32 %v3617_v7, %v1498_v8  ;;  %v1495_v52 = vpop.xlane.xlu0 %1494 }
 0x64a   :  { %v1517_v14 = vsub.f32 %v3624_v12, %v1495_v52 }
 0x64b   :  { %v1526_v58 = vmin.f32 %v1518_v18, 0.0 }
 0x64c   :  { %v1525_v37 = vmin.f32 %v1517_v14, 0.0  ;;  %v1513_v43 = vpop.xlane.xlu1 %1512 }
 0x64d   :  { %v1535_v6 = vmul.f32 1.442695, %v1526_v58  ;;  %v1501_v5 = vpop.xlane.xlu0 %1500  ;;  %v1523_v2 = vsub.f32 %v3626_v33, %v1513_v43 }
 0x64e   :  { %v1533_v48 = vmul.f32 1.442695, %v1525_v37  ;;  %v1519_v60 = vsub.f32 %v3635_v39, %v1501_v5 }
 0x64f   :  { %2909 = vpow2.f32 %v1535_v6  ;;  %v1531_v61 = vmin.f32 %v1523_v2, 0.0 }
 0x650   :  { %2911 = vpow2.f32 %v1533_v48  ;;  %v1527_v10 = vmin.f32 %v1519_v60, 0.0  ;;  %v1868_v0 = vpop.xlane.xlu1 %1867 }
 0x651   :  { %v1504_v54 = vpop.xlane.xlu0 %1503  ;;  %v1890_v7 = vsub.f32 %v3649_v26, %v1868_v0  ;;  %v1545_v44 = vmul.f32 1.442695, %v1531_v61 }
 0x652   :  { %v1537_v30 = vmul.f32 1.442695, %v1527_v10  ;;  %v1520_v12 = vsub.f32 %v3645_v21, %v1504_v54 }
 0x653   :  { %v1898_v42 = vmin.f32 %v1890_v7, 0.0 }
 0x654   :  { %2913 = vpow2.f32 %v1537_v30  ;;  %v1528_v27 = vmin.f32 %v1520_v12, 0.0  ;;  %v1874_v40 = vpop.xlane.xlu1 %1873 }
 0x655   :  { %v1507_v63 = vpop.xlane.xlu0 %1506  ;;  %v1892_v33 = vsub.f32 %v3658_v49, %v1874_v40  ;;  %v1906_v53 = vmul.f32 1.442695, %v1898_v42 }
 0x656   :  { %v1539_v17 = vmul.f32 1.442695, %v1528_v27  ;;  %v1521_v39 = vsub.f32 %v3660_v56, %v1507_v63 }
 0x657   :  { %v1900_v1 = vmin.f32 %v1892_v33, 0.0 }
 0x658   :  { %2915 = vpow2.f32 %v1539_v17  ;;  %v1529_v29 = vmin.f32 %v1521_v39, 0.0  ;;  %v1880_v13 = vpop.xlane.xlu1 %1879 }
 0x659   :  { %v2910_v47 = vpop.eup %2909  ;;  %v1510_v32 = vpop.xlane.xlu0 %1509  ;;  %2917 = vpow2.f32 %v1545_v44  ;;  %v1894_v46 = vsub.f32 %v3672_v55, %v1880_v13  ;;  %v1910_v55 = vmul.f32 1.442695, %v1900_v1 }
 0x65a   :  { %v2912_v26 = vpop.eup %2911  ;;  %v1541_v21 = vmul.f32 1.442695, %v1529_v29  ;;  %v1522_v45 = vsub.f32 %v3674_v62, %v1510_v32  ;;  %v1550_v50 = vmul.f32 %v2910_v47, %v3217_v15 }
 0x65b   :  { %v1549_v56 = vmul.f32 %v2912_v26, %v3219_v16  ;;  %v1902_v4 = vmin.f32 %v1894_v46, 0.0 }
 0x65c   :  { %2919 = vpow2.f32 %v1541_v21  ;;  %v1530_v49 = vmin.f32 %v1522_v45, 0.0  ;;  %v1886_v34 = vpop.xlane.xlu1 %1885  ;;  %v1560_v57 = vsel %vm334_vm2, %v1550_v50, 0.0 }
 0x65d   :  { %2613 = vmatprep.mubr.msk.f32.mxu0 %vm334_vm2, %v1549_v56  ;;  %v1516_v51 = vpop.xlane.xlu0 %1515  ;;  %1561 = vadd.xlane.f32.xlu1 %v1560_v57  ;;  %v1557_v25 = vsel %vm334_vm2, %v1549_v56, 0.0  ;;  %2921 = vpow2.f32 %v1906_v53  ;;  %v1896_v8 = vsub.f32 %v3686_v31, %v1886_v34  ;;  %v1914_v6 = vmul.f32 1.442695, %v1902_v4 }
 0x65e   :  { %v2914_v62 = vpop.eup %2913  ;;  %v1543_v9 = vmul.f32 1.442695, %v1530_v49  ;;  %v1524_v3 = vsub.f32 %v3688_v36, %v1516_v51  ;;  %1558 = vadd.xlane.f32.xlu0 %v1557_v25  ;;  %2614 = vmatmul.mubr.msk.f32.vlgmr.msra.gmra.mrb[16].mxu0 %vm334_vm2, %v1550_v50 }
 0x65f   :  { %2708 = vmatpush3.bf16.msra.mxu0 %v3597_v22  ;;  %v1551_v18 = vmul.f32 %v2914_v62, %v3226_v20  ;;  %v1904_v5 = vmin.f32 %v1896_v8, 0.0 }
 0x660   :  { %2923 = vpow2.f32 %v1543_v9  ;;  %v1532_v52 = vmin.f32 %v1524_v3, 0.0  ;;  %v2804_v26 = vpop.permute.xlu1 %2803 }
 0x661   :  { %v1871_v14 = vpop.xlane.xlu0 %1870  ;;  %2616 = vmatprep.mubr.msk.f32.mxu0 %vm334_vm2, %v1551_v18  ;;  %v1563_v58 = vsel %vm334_vm2, %v1551_v18, 0.0  ;;  %2925 = vpow2.f32 %v1910_v55  ;;  %v2806_v51 = vunpack.i.h.bf16 %v2804_v26  ;;  %v2805_v25 = vunpack.i.l.bf16 %v2804_v26 }
 0x662   :  { %v2916_v37 = vpop.eup %2915  ;;  %v1547_v36 = vmul.f32 1.442695, %v1532_v52  ;;  %v1891_v43 = vsub.f32 %v3700_v28, %v1871_v14  ;;  %1564 = vadd.xlane.f32.xlu0 %v1563_v58  ;;  %v1918_v28 = vmul.f32 1.442695, %v1904_v5 }
 0x663   :  { %v1552_v31 = vmul.f32 %v2916_v37, %v3233_v24  ;;  %v2918_v48 = vpop.eup %2917  ;;  %v2713_v52 = vpack.c.bf16 %v2806_v51, %v2805_v25 }
 0x664   :  { %2927 = vpow2.f32 %v1547_v36  ;;  %v1899_v22 = vmin.f32 %v1891_v43, 0.0  ;;  %v1555_v40 = vmul.f32 %v2918_v48, %v3224_v19  ;;  %v2809_v9 = vpop.permute.xlu1 %2808 }
 0x665   :  { %v1877_v60 = vpop.xlane.xlu0 %1876  ;;  %2617 = vmatmul.mubr.msk.f32.gmra.mrb[18].mxu0 %vm334_vm2, %v1552_v31  ;;  %v1566_v2 = vsel %vm334_vm2, %v1552_v31, 0.0  ;;  %2929 = vpow2.f32 %v1914_v6  ;;  %v2811_v14 = vunpack.i.h.bf16 %v2809_v9  ;;  %v2810_v58 = vunpack.i.l.bf16 %v2809_v9 }
 0x666   :  { %v2920_v10 = vpop.eup %2919  ;;  %v1908_v0 = vmul.f32 1.442695, %v1899_v22  ;;  %v1893_v54 = vsub.f32 %v3709_v23, %v1877_v60  ;;  %1567 = vadd.xlane.f32.xlu0 %v1566_v2  ;;  %v1575_v29 = vsel %vm334_vm2, %v1555_v40, 0.0 }
 0x667   :  { %v1553_v30 = vmul.f32 %v2920_v10, %v3272_v59  ;;  %v2922_v7 = vpop.eup %2921 }
 0x668   :  { %2931 = vpow2.f32 %v1908_v0  ;;  %v1901_v12 = vmin.f32 %v1893_v54, 0.0  ;;  %v1922_v47 = vmul.f32 %v2922_v7, %v3219_v16 }
 0x669   :  { %v1883_v61 = vpop.xlane.xlu0 %1882  ;;  %2619 = vmatprep.mubr.msk.f32.mxu0 %vm334_vm2, %v1553_v30  ;;  %v1569_v27 = vsel %vm334_vm2, %v1553_v30, 0.0  ;;  %2933 = vpow2.f32 %v1918_v28 }
 0x66a   :  { %v2924_v63 = vpop.eup %2923  ;;  %v1912_v42 = vmul.f32 1.442695, %v1901_v12  ;;  %v1895_v17 = vsub.f32 %v3717_v35, %v1883_v61  ;;  %1570 = vadd.xlane.f32.xlu1 %v1569_v27  ;;  %v1930_v46 = vsel %vm334_vm2, %v1922_v47, 0.0 }
 0x66b   :  { %v1554_v23 = vmul.f32 %v2924_v63, %v3293_v11  ;;  %v2926_v44 = vpop.eup %2925 }
 0x66c   :  { %2935 = vpow2.f32 %v1912_v42  ;;  %v1903_v39 = vmin.f32 %v1895_v17, 0.0  ;;  %v1924_v56 = vmul.f32 %v2926_v44, %v3226_v20 }
 0x66d   :  { %v1889_v33 = vpop.xlane.xlu0 %1888  ;;  %2620 = vmatmul.mubr.msk.f32.gmra.mrb[20].mxu0 %vm334_vm2, %v1554_v23  ;;  %v1572_v13 = vsel %vm334_vm2, %v1554_v23, 0.0 }
 0x66e   :  { %v2928_v32 = vpop.eup %2927  ;;  %v1916_v53 = vmul.f32 1.442695, %v1903_v39  ;;  %v1897_v35 = vsub.f32 %v3723_v41, %v1889_v33  ;;  %1576 = vadd.xlane.f32.xlu1 %v1575_v29  ;;  %1573 = vadd.xlane.f32.xlu0 %v1572_v13  ;;  %v1936_v4 = vsel %vm334_vm2, %v1924_v56, 0.0 }
 0x66f   :  { %2622 = vmatprep.mubr.msk.f32.mxu0 %vm334_vm2, %v1555_v40  ;;  %v1556_v21 = vmul.f32 %v2928_v32, %v3313_v38  ;;  %v2930_v50 = vpop.eup %2929 }
 0x670   :  { %2937 = vpow2.f32 %v1916_v53  ;;  %v1905_v45 = vmin.f32 %v1897_v35, 0.0  ;;  %v1926_v8 = vmul.f32 %v2930_v50, %v3272_v59  ;;  %v2717_v59 = vpack.c.bf16 %v2811_v14, %v2810_v58 }
 0x671   :  { %v2799_v1 = vpop.permute.xlu0 %2798  ;;  %2623 = vmatmul.mubr.msk.f32.gmra.mrb[22].mxu0 %vm334_vm2, %v1556_v21  ;;  %v1578_v16 = vsel %vm334_vm2, %v1556_v21, 0.0 }
 0x672   :  { %v2932_v49 = vpop.eup %2931  ;;  %v1920_v41 = vmul.f32 1.442695, %v1905_v45  ;;  %v2801_v34 = vunpack.i.h.bf16 %v2799_v1  ;;  %v2800_v57 = vunpack.i.l.bf16 %v2799_v1  ;;  %1931 = vadd.xlane.f32.xlu1 %v1930_v46  ;;  %1579 = vadd.xlane.f32.xlu0 %v1578_v16 }
 0x673   :  { %2641 = vmatprep.mubr.msk.f32.mxu0 %vm334_vm2, %v1922_v47  ;;  %v1923_v62 = vmul.f32 %v2932_v49, %v3217_v15  ;;  %v2934_v55 = vpop.eup %2933  ;;  %v1942_v15 = vsel %vm334_vm2, %v1926_v8, 0.0 }
 0x674   :  { %2939 = vpow2.f32 %v1920_v41  ;;  %v2709_v3 = vpack.c.bf16 %v2801_v34, %v2800_v57  ;;  %v1928_v43 = vmul.f32 %v2934_v55, %v3224_v19 }
 0x675   :  { %v1933_v20 = vsel %vm334_vm2, %v1923_v62, 0.0 }
 0x676   :  { %v2936_v18 = vpop.eup %2935  ;;  %1937 = vadd.xlane.f32.xlu1 %v1936_v4  ;;  %1934 = vadd.xlane.f32.xlu0 %v1933_v20  ;;  %v1948_v31 = vsel %vm334_vm2, %v1928_v43, 0.0 }
 0x677   :  { %2710 = vmatprep.subr.bf16.mxu0 %v2709_v3  ;;  %v1925_v37 = vmul.f32 %v2936_v18, %v3233_v24 }
 0x678   :  { %2712 = vmatpush3.bf16.msra.mxu0 %v2709_v3 }
 0x679   :  { %2714 = vmatprep.subr.bf16.mxu0 %v2713_v52  ;;  %v1939_v36 = vsel %vm334_vm2, %v1925_v37, 0.0 }
 0x67a   :  { %v2938_v6 = vpop.eup %2937  ;;  %1943 = vadd.xlane.f32.xlu1 %v1942_v15  ;;  %1940 = vadd.xlane.f32.xlu0 %v1939_v36 }
 0x67b   :  { %v1927_v5 = vmul.f32 %v2938_v6, %v3293_v11 }
 0x67c   :  { %2716 = vmatpush3.bf16.msra.mxu0 %v2713_v52 }
 0x67d   :  { %2718 = vmatprep.subr.bf16.mxu0 %v2717_v59  ;;  %v1945_v24 = vsel %vm334_vm2, %v1927_v5, 0.0 }
 0x67e   :  { %v2940_v22 = vpop.eup %2939  ;;  %1949 = vadd.xlane.f32.xlu1 %v1948_v31  ;;  %1946 = vadd.xlane.f32.xlu0 %v1945_v24 }
 0x67f   :  { %v1929_v48 = vmul.f32 %v2940_v22, %v3313_v38 }
 0x680   :  { %2720 = vmatpush3.bf16.msra.mxu0 %v2717_v59 }
 0x681   :  { %v1951_v19 = vsel %vm334_vm2, %v1929_v48, 0.0 }
 0x682   :  { %1952 = vadd.xlane.f32.xlu0 %v1951_v19 }
 0x683   :  { %2642 = vmatmul.mubr.msk.f32.vlgmr.msra.gmra.mrb[24].mxu0 %vm334_vm2, %v1923_v62 }
 0x684   :  { %2644 = vmatprep.mubr.msk.f32.mxu0 %vm334_vm2, %v1924_v56 }
 0x687   :  { %2645 = vmatmul.mubr.msk.f32.gmra.mrb[26].mxu0 %vm334_vm2, %v1925_v37 }
 0x688   :  { %2647 = vmatprep.mubr.msk.f32.mxu0 %vm334_vm2, %v1926_v8 }
 0x68b   :  { %2648 = vmatmul.mubr.msk.f32.gmra.mrb[28].mxu0 %vm334_vm2, %v1927_v5 }
 0x68c   :  { %2650 = vmatprep.mubr.msk.f32.mxu0 %vm334_vm2, %v1928_v43 }
 0x68f   :  { %2651 = vmatmul.mubr.msk.f32.gmra.mrb[30].mxu0 %vm334_vm2, %v1929_v48 }
 0x6ea   :  { %v1562_v2 = vpop.xlane.xlu1 %1561 }
 0x6eb   :  { %v1559_v11 = vpop.xlane.xlu0 %1558  ;;  %v1711_v44 = vadd.f32 9e-15, %v1562_v2 }
 0x6ec   :  { %v1710_v29 = vadd.f32 9e-15, %v1559_v11 }
 0x6ed   :  { %2941 = vrcp.f32 %v1711_v44 }
 0x6ee   :  { %2943 = vrcp.f32 %v1710_v29 }
 0x6ef   :  { %v1565_v38 = vpop.xlane.xlu0 %1564 }
 0x6f0   :  { %v1712_v32 = vadd.f32 9e-15, %v1565_v38 }
 0x6f3   :  { %v1568_v60 = vpop.xlane.xlu0 %1567 }
 0x6f4   :  { %v1713_v26 = vadd.f32 9e-15, %v1568_v60 }
 0x6f7   :  { %v1571_v28 = vpop.xlane.xlu1 %1570  ;;  %v2942_v57 = vpop.eup %2941 }
 0x6f8   :  { %v1714_v50 = vadd.f32 9e-15, %v1571_v28  ;;  %v2944_v25 = vpop.eup %2943 }
 0x6fb   :  { %v1574_v54 = vpop.xlane.xlu0 %1573  ;;  %v1577_v61 = vpop.xlane.xlu1 %1576 }
 0x6fc   :  { %v1715_v1 = vadd.f32 9e-15, %v1574_v54  ;;  %v1716_v49 = vadd.f32 9e-15, %v1577_v61 }
 0x6ff   :  { %v1580_v7 = vpop.xlane.xlu0 %1579  ;;  %v1932_v40 = vpop.xlane.xlu1 %1931 }
 0x700   :  { %v2107_v47 = vadd.f32 9e-15, %v1932_v40  ;;  %v1717_v34 = vadd.f32 9e-15, %v1580_v7 }
 0x703   :  { %v1935_v27 = vpop.xlane.xlu0 %1934  ;;  %v1938_v33 = vpop.xlane.xlu1 %1937 }
 0x704   :  { %v2108_v13 = vadd.f32 9e-15, %v1935_v27  ;;  %v2109_v45 = vadd.f32 9e-15, %v1938_v33 }
 0x706   :  { %2945 = vrcp.f32 %v2108_v13 }
 0x707   :  { %v1941_v23 = vpop.xlane.xlu0 %1940  ;;  %v1944_v35 = vpop.xlane.xlu1 %1943  ;;  %2947 = vrcp.f32 %v2107_v47 }
 0x708   :  { %v2110_v21 = vadd.f32 9e-15, %v1941_v23  ;;  %2949 = vrcp.f32 %v1712_v32  ;;  %v2111_v16 = vadd.f32 9e-15, %v1944_v35 }
 0x709   :  { %2951 = vrcp.f32 %v1713_v26 }
 0x70a   :  { %2953 = vrcp.f32 %v2110_v21 }
 0x70b   :  { %v1947_v53 = vpop.xlane.xlu0 %1946  ;;  %2955 = vrcp.f32 %v2109_v45  ;;  %v1950_v41 = vpop.xlane.xlu1 %1949 }
 0x70c   :  { %v2112_v46 = vadd.f32 9e-15, %v1947_v53  ;;  %2957 = vrcp.f32 %v1714_v50  ;;  %v2113_v62 = vadd.f32 9e-15, %v1950_v41 }
 0x70d   :  { %2959 = vrcp.f32 %v1715_v1 }
 0x70e   :  { %2961 = vrcp.f32 %v2112_v46 }
 0x70f   :  { %v1953_v56 = vpop.xlane.xlu0 %1952  ;;  %2963 = vrcp.f32 %v2111_v16 }
 0x710   :  { %v2114_v51 = vadd.f32 9e-15, %v1953_v56  ;;  %v2946_v9 = vpop.eup %2945  ;;  %2965 = vrcp.f32 %v1716_v49 }
 0x711   :  { %v2948_v55 = vpop.eup %2947  ;;  %2967 = vrcp.f32 %v1717_v34 }
 0x712   :  { %v2950_v18 = vpop.eup %2949  ;;  %2969 = vrcp.f32 %v2114_v51 }
 0x713   :  { %v2952_v58 = vpop.eup %2951  ;;  %2971 = vrcp.f32 %v2113_v62 }
 0x714   :  { %v2954_v15 = vpop.eup %2953 }
 0x715   :  { %v2956_v6 = vpop.eup %2955 }
 0x716   :  { %v2958_v22 = vpop.eup %2957 }
 0x717   :  { %v2960_v38 = vpop.eup %2959 }
 0x731   :  { %v2615_v10 = vpop.f32.mrb[16].mxu0 }
 0x732   :  { %v1671_v0 = vpop.f32.mrb[17].mxu0  ;;  %v1727_v4 = vmul.f32 %v2942_v57, %v2615_v10  ;;  %v2962_v10 = vpop.eup %2961 }
 0x733   :  { %v1726_v52 = vmul.f32 %v2944_v25, %v1671_v0 }
 0x738   :  { %v3806_v30 = vpop.f32.mrb[18].mxu0 }
 0x739   :  { %v3808_v12 = vpop.f32.mrb[19].mxu0  ;;  %v1729_v59 = vmul.f32 %v2952_v58, %v3806_v30  ;;  %v2964_v30 = vpop.eup %2963 }
 0x73a   :  { %v1728_v48 = vmul.f32 %v2950_v18, %v3808_v12  ;;  %v2966_v23 = vpop.eup %2965 }
 0x73b   :  { %v2968_v47 = vpop.eup %2967 }
 0x73c   :  { %v2970_v53 = vpop.eup %2969 }
 0x73d   :  { %v2972_v45 = vpop.eup %2971 }
 0x740   :  { %v3810_v63 = vpop.f32.mrb[20].mxu0 }
 0x741   :  { %v3812_v42 = vpop.f32.mrb[21].mxu0  ;;  %v1731_v7 = vmul.f32 %v2960_v38, %v3810_v63 }
 0x742   :  { %v1730_v44 = vmul.f32 %v2958_v22, %v3812_v42 }
 0x744   :  { %v3814_v17 = vpop.f32.mrb[22].mxu0 }
 0x745   :  { %v3816_v39 = vpop.f32.mrb[23].mxu0  ;;  %v1733_v50 = vmul.f32 %v2968_v47, %v3814_v17 }
 0x746   :  { %v1732_v56 = vmul.f32 %v2966_v23, %v3816_v39 }
 0x756   :  { %v2643_v3 = vpop.f32.mrb[24].mxu0 }
 0x757   :  { %v2124_v20 = vmul.f32 %v2946_v9, %v2643_v3  ;;  %v2068_v8 = vpop.f32.mrb[25].mxu0 }
 0x758   :  { %v2123_v14 = vmul.f32 %v2948_v55, %v2068_v8 }
 0x759   :  { %v2132_v37 = vadd.f32 %v2124_v20, %v1727_v4 }
 0x75a   :  { %v2131_v36 = vadd.f32 %v2123_v14, %v1726_v52  ;;  %v2646_v43 = vpop.f32.mrb[26].mxu0 }
 0x75b   :  { %v3819_v5 = vmul.f32 0.5, %v2132_v37  ;;  %v2126_v31 = vmul.f32 %v2954_v15, %v2646_v43  ;;  %v2078_v24 = vpop.f32.mrb[27].mxu0 }
 0x75c   :  { %v3822_v19 = vmul.f32 0.5, %v2131_v36  ;;  %v2125_v11 = vmul.f32 %v2956_v6, %v2078_v24 }
 0x75d   :  { %v2156_v60 = vmin.f32 %v3819_v5, 0.0  ;;  %v2134_v2 = vadd.f32 %v2126_v31, %v1729_v59  ;;  %vm2148_vm2 = vcmp.gt.f32.partialorder %v3819_v5, 0.0 }
 0x75e   :  { %v2155_v0 = vmin.f32 %v3822_v19, 0.0  ;;  %v2133_v54 = vadd.f32 %v2125_v11, %v1728_v48  ;;  %v2649_v28 = vpop.f32.mrb[28].mxu0  ;;  %vm2147_vm12 = vcmp.gt.f32.partialorder %v3822_v19, 0.0 }
 0x75f   :  { %v2165_v61 = vmul.f32 1.442695, %v2156_v60  ;;  %v3827_v27 = vmul.f32 0.5, %v2134_v2  ;;  %v2128_v40 = vmul.f32 %v2962_v10, %v2649_v28  ;;  %v2088_v12 = vpop.f32.mrb[29].mxu0 }
 0x760   :  { %v2163_v33 = vmul.f32 1.442695, %v2155_v0  ;;  %v2141_v29 = vmul.f32 0.5, %v2133_v54  ;;  %v2127_v13 = vmul.f32 %v2964_v30, %v2088_v12 }
 0x761   :  { %2973 = vpow2.f32 %v2165_v61  ;;  %v2158_v32 = vmin.f32 %v3827_v27, 0.0  ;;  %v2136_v26 = vadd.f32 %v2128_v40, %v1731_v7  ;;  %vm2150_vm7 = vcmp.gt.f32.partialorder %v3827_v27, 0.0 }
 0x762   :  { %2975 = vpow2.f32 %v2163_v33  ;;  %v2157_v35 = vmin.f32 %v2141_v29, 0.0  ;;  %v2135_v63 = vadd.f32 %v2127_v13, %v1730_v44  ;;  %v2652_v21 = vpop.f32.mrb[30].mxu0  ;;  %vm2149_vm10 = vcmp.gt.f32.partialorder %v2141_v29, 0.0 }
 0x763   :  { %v2169_v1 = vmul.f32 1.442695, %v2158_v32  ;;  %v2144_v46 = vmul.f32 0.5, %v2136_v26  ;;  %v2130_v16 = vmul.f32 %v2970_v53, %v2652_v21  ;;  %v2098_v42 = vpop.f32.mrb[31].mxu0 }
 0x764   :  { %v2167_v49 = vmul.f32 1.442695, %v2157_v35  ;;  %v2143_v41 = vmul.f32 0.5, %v2135_v63  ;;  %v2129_v34 = vmul.f32 %v2972_v45, %v2098_v42 }
 0x765   :  { %2977 = vpow2.f32 %v2169_v1  ;;  %v2160_v57 = vmin.f32 %v2144_v46, 0.0  ;;  %v2138_v51 = vadd.f32 %v2130_v16, %v1733_v50  ;;  %vm2152_vm11 = vcmp.gt.f32.partialorder %v2144_v46, 0.0 }
 0x766   :  { %2979 = vpow2.f32 %v2167_v49  ;;  %v2159_v25 = vmin.f32 %v2143_v41, 0.0  ;;  %v2137_v62 = vadd.f32 %v2129_v34, %v1732_v56  ;;  %vm2151_vm13 = vcmp.gt.f32.partialorder %v2143_v41, 0.0 }
 0x767   :  { %v2173_v9 = vmul.f32 1.442695, %v2160_v57  ;;  %v2146_v3 = vmul.f32 0.5, %v2138_v51 }
 0x768   :  { %v2171_v55 = vmul.f32 1.442695, %v2159_v25  ;;  %v2145_v4 = vmul.f32 0.5, %v2137_v62 }
 0x769   :  { %2981 = vpow2.f32 %v2173_v9  ;;  %v2162_v17 = vmin.f32 %v2146_v3, 0.0  ;;  %vm2154_vm6 = vcmp.gt.f32.partialorder %v2146_v3, 0.0 }
 0x76a   :  { %2983 = vpow2.f32 %v2171_v55  ;;  %v2161_v20 = vmin.f32 %v2145_v4, 0.0  ;;  %vm2153_vm14 = vcmp.gt.f32.partialorder %v2145_v4, 0.0 }
 0x76b   :  { %v2974_v8 = vpop.eup %2973  ;;  %v2177_v18 = vmul.f32 1.442695, %v2162_v17 }
 0x76c   :  { %v2976_v39 = vpop.eup %2975  ;;  %v2175_v52 = vmul.f32 1.442695, %v2161_v20  ;;  %v2379_v14 = vadd.f32 -1.0, %v2974_v8 }
 0x76d   :  { %2985 = vpow2.f32 %v2177_v18  ;;  %v2378_v58 = vadd.f32 -1.0, %v2976_v39 }
 0x76e   :  { %2987 = vpow2.f32 %v2175_v52  ;;  %v2188_v37 = vsel %vm2148_vm2, %v3819_v5, %v2379_v14 }
 0x76f   :  { %v2978_v15 = vpop.eup %2977  ;;  %v2199_v36 = vsel %vm2195_vm1, %v2188_v37, -inf  ;;  %v2187_v43 = vsel %vm2147_vm12, %v3822_v19, %v2378_v58 }
 0x770   :  { %v2980_v6 = vpop.eup %2979  ;;  %2200 = vmax.xlane.f32.xlu0 %v2199_v36  ;;  %v2196_v59 = vsel %vm2195_vm1, %v2187_v43, -inf  ;;  %v2381_v31 = vadd.f32 -1.0, %v2978_v15 }
 0x771   :  { %2197 = vmax.xlane.f32.xlu1 %v2196_v59  ;;  %v2380_v24 = vadd.f32 -1.0, %v2980_v6 }
 0x772   :  { %v2190_v22 = vsel %vm2150_vm7, %v3827_v27, %v2381_v31 }
 0x773   :  { %v2982_v5 = vpop.eup %2981  ;;  %v2205_v48 = vsel %vm2195_vm1, %v2190_v22, -inf  ;;  %v2189_v11 = vsel %vm2149_vm10, %v2141_v29, %v2380_v24 }
 0x774   :  { %v2984_v38 = vpop.eup %2983  ;;  %2206 = vmax.xlane.f32.xlu0 %v2205_v48  ;;  %v2202_v19 = vsel %vm2195_vm1, %v2189_v11, -inf  ;;  %v2383_v60 = vadd.f32 -1.0, %v2982_v5 }
 0x775   :  { %2203 = vmax.xlane.f32.xlu1 %v2202_v19  ;;  %v2382_v2 = vadd.f32 -1.0, %v2984_v38 }
 0x776   :  { %v2192_v10 = vsel %vm2152_vm11, %v2144_v46, %v2383_v60 }
 0x777   :  { %v2986_v0 = vpop.eup %2985  ;;  %v2211_v54 = vsel %vm2195_vm1, %v2192_v10, -inf  ;;  %v2191_v28 = vsel %vm2151_vm13, %v2143_v41, %v2382_v2 }
 0x778   :  { %v2988_v30 = vpop.eup %2987  ;;  %2212 = vmax.xlane.f32.xlu0 %v2211_v54  ;;  %v2208_v7 = vsel %vm2195_vm1, %v2191_v28, -inf  ;;  %v2385_v61 = vadd.f32 -1.0, %v2986_v0 }
 0x779   :  { %2209 = vmax.xlane.f32.xlu1 %v2208_v7  ;;  %v2384_v27 = vadd.f32 -1.0, %v2988_v30 }
 0x77a   :  { %v2194_v40 = vsel %vm2154_vm6, %v2146_v3, %v2385_v61 }
 0x77b   :  { %v2217_v12 = vsel %vm2195_vm1, %v2194_v40, -inf  ;;  %v2193_v23 = vsel %vm2153_vm14, %v2145_v4, %v2384_v27 }
 0x77c   :  { %2218 = vmax.xlane.f32.xlu0 %v2217_v12  ;;  %v2214_v44 = vsel %vm2195_vm1, %v2193_v23, -inf }
 0x77d   :  { %2215 = vmax.xlane.f32.xlu1 %v2214_v44 }
 0x7fd   :  { %v2201_v33 = vpop.xlane.xlu0 %2200 }
 0x7fe   :  { %v3847_v29 = vsub.f32 %v2188_v37, %v2201_v33  ;;  %v2198_v13 = vpop.xlane.xlu1 %2197 }
 0x7ff   :  { %v3849_v47 = vsub.f32 %v2187_v43, %v2198_v13 }
 0x800   :  { %v2230_v32 = vmul.f32 1.442695, %v3847_v29 }
 0x801   :  { %v2228_v26 = vmul.f32 1.442695, %v3849_v47  ;;  %v2207_v53 = vpop.xlane.xlu0 %2206 }
 0x802   :  { %2989 = vpow2.f32 %v2230_v32  ;;  %v3853_v35 = vsub.f32 %v2190_v22, %v2207_v53  ;;  %v2204_v63 = vpop.xlane.xlu1 %2203 }
 0x803   :  { %2991 = vpow2.f32 %v2228_v26  ;;  %v3855_v21 = vsub.f32 %v2189_v11, %v2204_v63 }
 0x804   :  { %v2234_v45 = vmul.f32 1.442695, %v3853_v35 }
 0x805   :  { %v2232_v50 = vmul.f32 1.442695, %v3855_v21  ;;  %v2213_v1 = vpop.xlane.xlu0 %2212 }
 0x806   :  { %2993 = vpow2.f32 %v2234_v45  ;;  %v3859_v46 = vsub.f32 %v2192_v10, %v2213_v1  ;;  %v2210_v16 = vpop.xlane.xlu1 %2209 }
 0x807   :  { %2995 = vpow2.f32 %v2232_v50  ;;  %v3861_v42 = vsub.f32 %v2191_v28, %v2210_v16 }
 0x808   :  { %v2238_v56 = vmul.f32 1.442695, %v3859_v46 }
 0x809   :  { %v2236_v49 = vmul.f32 1.442695, %v3861_v42  ;;  %v2219_v41 = vpop.xlane.xlu0 %2218 }
 0x80a   :  { %2997 = vpow2.f32 %v2238_v56  ;;  %v3865_v34 = vsub.f32 %v2194_v40, %v2219_v41  ;;  %v2216_v57 = vpop.xlane.xlu1 %2215 }
 0x80b   :  { %2999 = vpow2.f32 %v2236_v49  ;;  %v3867_v51 = vsub.f32 %v2193_v23, %v2216_v57 }
 0x80c   :  { %v2990_v25 = vpop.eup %2989  ;;  %v2242_v62 = vmul.f32 1.442695, %v3865_v34 }
 0x80d   :  { %v2992_v9 = vpop.eup %2991  ;;  %v2240_v3 = vmul.f32 1.442695, %v3867_v51  ;;  %v2247_v55 = vsel %vm2195_vm1, %v2990_v25, 0.0 }
 0x80e   :  { %3001 = vpow2.f32 %v2242_v62  ;;  %2248 = vadd.xlane.f32.xlu0 %v2247_v55  ;;  %v2244_v4 = vsel %vm2195_vm1, %v2992_v9, 0.0 }
 0x80f   :  { %3003 = vpow2.f32 %v2240_v3  ;;  %2245 = vadd.xlane.f32.xlu1 %v2244_v4 }
 0x810   :  { %v2994_v17 = vpop.eup %2993 }
 0x811   :  { %v2996_v20 = vpop.eup %2995  ;;  %v2253_v8 = vsel %vm2195_vm1, %v2994_v17, 0.0 }
 0x812   :  { %2254 = vadd.xlane.f32.xlu0 %v2253_v8  ;;  %v2250_v18 = vsel %vm2195_vm1, %v2996_v20, 0.0 }
 0x813   :  { %2251 = vadd.xlane.f32.xlu1 %v2250_v18 }
 0x814   :  { %v2998_v39 = vpop.eup %2997 }
 0x815   :  { %v3000_v52 = vpop.eup %2999  ;;  %v2259_v14 = vsel %vm2195_vm1, %v2998_v39, 0.0 }
 0x816   :  { %2260 = vadd.xlane.f32.xlu0 %v2259_v14  ;;  %v2256_v58 = vsel %vm2195_vm1, %v3000_v52, 0.0 }
 0x817   :  { %2257 = vadd.xlane.f32.xlu1 %v2256_v58 }
 0x818   :  { %v3002_v37 = vpop.eup %3001 }
 0x819   :  { %v3004_v15 = vpop.eup %3003  ;;  %v2265_v36 = vsel %vm2195_vm1, %v3002_v37, 0.0 }
 0x81a   :  { %2266 = vadd.xlane.f32.xlu0 %v2265_v36  ;;  %v2262_v43 = vsel %vm2195_vm1, %v3004_v15, 0.0 }
 0x81b   :  { %2263 = vadd.xlane.f32.xlu1 %v2262_v43 }
 0x89b   :  { %v2249_v6 = vpop.xlane.xlu0 %2248 }
 0x89c   :  { %3005 = vlog2.f32 %v2249_v6  ;;  %v2246_v59 = vpop.xlane.xlu1 %2245 }
 0x89d   :  { %3007 = vlog2.f32 %v2246_v59 }
 0x89f   :  { %v2255_v31 = vpop.xlane.xlu0 %2254 }
 0x8a0   :  { %3009 = vlog2.f32 %v2255_v31  ;;  %v2252_v24 = vpop.xlane.xlu1 %2251 }
 0x8a1   :  { %3011 = vlog2.f32 %v2252_v24 }
 0x8a3   :  { %v2261_v22 = vpop.xlane.xlu0 %2260 }
 0x8a4   :  { %3013 = vlog2.f32 %v2261_v22  ;;  %v2258_v5 = vpop.xlane.xlu1 %2257 }
 0x8a5   :  { %3015 = vlog2.f32 %v2258_v5 }
 0x8a6   :  { %v3006_v48 = vpop.eup %3005 }
 0x8a7   :  { %v3008_v11 = vpop.eup %3007  ;;  %v2271_v38 = vmul.f32 0.6931472, %v3006_v48  ;;  %v2267_v19 = vpop.xlane.xlu0 %2266 }
 0x8a8   :  { %v2269_v60 = vmul.f32 0.6931472, %v3008_v11  ;;  %3017 = vlog2.f32 %v2267_v19  ;;  %v2264_v2 = vpop.xlane.xlu1 %2263 }
 0x8a9   :  { %v2285_v10 = vsub.f32 %v3847_v29, %v2271_v38  ;;  %3019 = vlog2.f32 %v2264_v2 }
 0x8aa   :  { %v3010_v0 = vpop.eup %3009  ;;  %v2284_v54 = vsub.f32 %v3849_v47, %v2269_v60 }
 0x8ab   :  { %v3012_v28 = vpop.eup %3011  ;;  %2293 = vst.msk [vmem:[%s3925_s6 + $0x8] sm:$0xff] %vm2195_vm1, %v2285_v10  ;;  %v2275_v30 = vmul.f32 0.6931472, %v3010_v0 }
 0x8ac   :  { %2292 = vst.msk [vmem:[%s3925_s6] sm:$0xff] %vm2195_vm1, %v2284_v54  ;;  %v2273_v7 = vmul.f32 0.6931472, %v3012_v28 }
 0x8ad   :  { %v2287_v61 = vsub.f32 %v3853_v35, %v2275_v30 }
 0x8ae   :  { %v3014_v27 = vpop.eup %3013  ;;  %v2286_v40 = vsub.f32 %v3855_v21, %v2273_v7 }
 0x8af   :  { %v3016_v12 = vpop.eup %3015  ;;  %2295 = vst.msk [vmem:[%s3925_s6 + $0x18] sm:$0xff] %vm2195_vm1, %v2287_v61  ;;  %v2279_v23 = vmul.f32 0.6931472, %v3014_v27 }
 0x8b0   :  { %2294 = vst.msk [vmem:[%s3925_s6 + $0x10] sm:$0xff] %vm2195_vm1, %v2286_v40  ;;  %v2277_v44 = vmul.f32 0.6931472, %v3016_v12 }
 0x8b1   :  { %v2289_v33 = vsub.f32 %v3859_v46, %v2279_v23 }
 0x8b2   :  { %v3018_v29 = vpop.eup %3017  ;;  %v2288_v13 = vsub.f32 %v3861_v42, %v2277_v44 }
 0x8b3   :  { %v3020_v47 = vpop.eup %3019  ;;  %2297 = vst.msk [vmem:[%s3925_s6 + $0x28] sm:$0xff] %vm2195_vm1, %v2289_v33  ;;  %v2283_v32 = vmul.f32 0.6931472, %v3018_v29 }
 0x8b4   :  { %2296 = vst.msk [vmem:[%s3925_s6 + $0x20] sm:$0xff] %vm2195_vm1, %v2288_v13  ;;  %v2281_v26 = vmul.f32 0.6931472, %v3020_v47 }
 0x8b5   :  { %v2291_v53 = vsub.f32 %v3865_v34, %v2283_v32 }
 0x8b6   :  { %v2290_v35 = vsub.f32 %v3867_v51, %v2281_v26 }
 0x8b7   :  { %2299 = vst.msk [vmem:[%s3925_s6 + $0x38] sm:$0xff] %vm2195_vm1, %v2291_v53 }
 0x8b8   :  { %2298 = vst.msk [vmem:[%s3925_s6 + $0x30] sm:$0xff] %vm2195_vm1, %v2290_v35 }

</bundles_post_ra>
